<compile_context>
chip_gen: v6e
topology: v6e:2x2x1
jax: 0.10.0
libtpu: 0.0.40
codegen_flags: <defaults>
</compile_context>

<pallas_src>
import functools

import numpy as np
import jax
import jax.numpy as jnp
from jax import lax
from jax.experimental import pallas as pl
from jax.experimental.pallas import tpu as pltpu


# ----------------------------------------------------------------------------
# Mirror of the PyTorch module's `_kernel` helper (kernel size / padding pick)
# ----------------------------------------------------------------------------
def _kernel_size_and_padding(out_ch, Df=16, padding=0):
    for k in range(out_ch):
        if k > 1 and out_ch % k == 0 and k <= out_ch / Df:
            return k, padding
    ks = _kernel_size_and_padding(out_ch + 1, Df=Df, padding=padding + 1)
    if ks is not None:
        return ks[0], padding + 1


# ----------------------------------------------------------------------------
# In-kernel helper: fused-LHS for pooling phase (r, c).
# Returns [nb*U*V, 4*Cin] bf16 whose channel order is tap order (kh*2+kw), so a
# single flattened HWIO weight matrix [4*Cin, Cout] serves every phase.
# ----------------------------------------------------------------------------
def _phase_lhs(x_ref, r, c, nb, U, V, cin):
    if (r, c) == (0, 0):
        # all 4 taps read the same cell -> contiguous 4*Cin channel block
        xs = x_ref[0:nb, 0:U, 0:V, :]
    else:
        pieces = []
        for kh in range(2):
            for kw in range(2):
                du, p = (r + kh) // 2, (r + kh) % 2   # cell-row shift / row phase
                dv, q = (c + kw) // 2, (c + kw) % 2   # cell-col shift / col phase
                b = p * 2 + q                          # channel block in x_std
                pieces.append(x_ref[0:nb, du:du + U, dv:dv + V,
                                    b * cin:(b + 1) * cin])
        xs = jnp.concatenate(pieces, axis=-1)          # [nb, U, V, 4*Cin]
    return xs.reshape(nb * U * V, 4 * cin)


# ----------------------------------------------------------------------------
# Pass 1: streaming conv -> per-channel sum / sum-of-squares.
# Grid = (NC, NBC): NC per-core partial accumulators ("parallel"), NBC image
# blocks accumulated sequentially ("arbitrary", init via pl.when).
# ----------------------------------------------------------------------------
def _stats_kernel(x_ref, w_ref, stats_ref, *, nb, cin, cout, OH, OW):
    @pl.when(pl.program_id(1) == 0)
    def _init():
        stats_ref[...] = jnp.zeros_like(stats_ref)

    s1 = jnp.zeros((1, cout), jnp.float32)
    s2 = jnp.zeros((1, cout), jnp.float32)
    for r in range(2):
        for c in range(2):
            U = (OH + 1 - r) // 2          # exact valid extent -> no masking
            V = (OW + 1 - c) // 2
            lhs = _phase_lhs(x_ref, r, c, nb, U, V, cin)
            acc = jnp.dot(lhs, w_ref[...], preferred_element_type=jnp.float32)
            s1 = s1 + jnp.sum(acc, axis=0, keepdims=True)
            s2 = s2 + jnp.sum(acc * acc, axis=0, keepdims=True)
    stats_ref[0] = stats_ref[0] + jnp.concatenate([s1, s2], axis=0)


# ----------------------------------------------------------------------------
# Pass 2: recompute conv (fused matmuls), BN-normalize with global batch stats,
# ReLU, and the 2x2/stride-2 max-pool fused (max over the 4 pooling phases).
# ----------------------------------------------------------------------------
def _norm_pool_kernel(x_ref, w_ref, stats_ref, gamma_ref, beta_ref, o_ref, *,
                      nb, PH, PW, cin, cout, inv_m, eps):
    mean = stats_ref[0:1, :] * inv_m                      # [1, Cout] f32
    var = stats_ref[1:2, :] * inv_m - mean * mean
    scale = gamma_ref[...] * lax.rsqrt(var + eps)
    shift = beta_ref[...] - mean * scale

    pooled = jnp.full((nb * PH * PW, cout), -jnp.inf, jnp.float32)
    for r in range(2):
        for c in range(2):
            lhs = _phase_lhs(x_ref, r, c, nb, PH, PW, cin)
            acc = jnp.dot(lhs, w_ref[...], preferred_element_type=jnp.float32)
            z = jnp.maximum(acc * scale + shift, 0.0)     # BN affine + ReLU (f32)
            pooled = jnp.maximum(pooled, z)               # fused 2x2 max-pool
    o_ref[0] = pooled


# ----------------------------------------------------------------------------
# Conv block wrapper (layout glue in plain JAX, all compute in Pallas)
# ----------------------------------------------------------------------------
class ConvPallas:
    def __init__(self, in_ch, out_ch, key):
        self.in_ch, self.out_ch = in_ch, out_ch
        self.k, self.pad = _kernel_size_and_padding(out_ch, Df=16)
        assert self.k == 2, "this model's _kernel() always yields k=2"
        kw_, kb_ = jax.random.split(key)
        self.w = 0.1 * jax.random.normal(
            kw_, (out_ch, in_ch, self.k, self.k), jnp.float32)   # OIHW
        # Conv bias kept for parity with the PyTorch module; it cancels exactly
        # under training-mode BatchNorm, so the Pallas kernels never read it.
        self.b = 0.1 * jax.random.normal(kb_, (out_ch,), jnp.float32)
        self.gamma = jnp.ones((out_ch,), jnp.float32)
        self.beta = jnp.zeros((out_ch,), jnp.float32)

    def __call__(self, x):
        # x: [N, Cin, H, W] (NCHW, PyTorch convention)
        if x.shape[-1] == 1:          # mirrors the module's early-return branch
            return x
        N, Cin, H, W = x.shape
        Cout, pad = self.out_ch, self.pad
        if pad:
            x = jnp.pad(x, ((0, 0), (0, 0), (pad, pad), (pad, pad)))
        Hp, Wp = H + 2 * pad, W + 2 * pad
        OH, OW = Hp - 1, Wp - 1               # conv output size (k=2, stride 1)
        PH, PW = OH // 2, OW // 2             # pooled output size (floor)
        HC, WC = (Hp + 1) // 2, (Wp + 1) // 2   # 2x2 cell grid (no extra +1 row)

        # ---- layout prep (one x-sized pass, no im2col duplication) ----------
        xe = jnp.pad(x, ((0, 0), (0, 0), (0, 2 * HC - Hp), (0, 2 * WC - Wp)))
        # NCHW -> space-to-depth NHWC: channel block (p, q) holds pixel (2i+p, 2j+q)
        x_std = (xe.reshape(N, Cin, HC, 2, WC, 2)
                 .transpose(0, 2, 4, 3, 5, 1)
                 .reshape(N, HC, WC, 4 * Cin)
                 .astype(jnp.bfloat16))
        # OIHW weights -> flattened HWIO [4*Cin, Cout], row = (kh*2+kw)*Cin + c
        w_mat = (self.w.transpose(2, 3, 1, 0)
                 .reshape(4 * Cin, Cout).astype(jnp.bfloat16))

        # ---- image-batching tile choice --------------------------------------
        rows_per_img = HC * WC
        per_img_bytes = rows_per_img * 4 * Cin * 2          # bf16 x_std bytes
        nb_cap = min(N,
                     max(1, (8 << 20) // max(per_img_bytes, 1)),     # VMEM cap
                     max(1, (192 + rows_per_img - 1) // rows_per_img))  # ~128-256 rows
        Nb = max(d for d in range(1, N + 1) if N % d == 0 and d <= nb_cap)
        NB = N // Nb                       # number of image blocks
        NC = 2 if NB % 2 == 0 else 1       # split pass-1 over 2 cores (v7x) if possible
        NBC = NB // NC

        cparams = pltpu.CompilerParams(
            dimension_semantics=("parallel", "arbitrary"),
            vmem_limit_bytes=32 * 1024 * 1024)   # safe on v5e/v6e/v7x; blocks are KBs
        cparams_par = pltpu.CompilerParams(
            dimension_semantics=("parallel",),
            vmem_limit_bytes=32 * 1024 * 1024)

        x_spec1 = pl.BlockSpec((Nb, HC, WC, 4 * Cin),
                               lambda ci, ni: (ci * NBC + ni, 0, 0, 0))
        w_spec1 = pl.BlockSpec((4 * Cin, Cout), lambda ci, ni: (0, 0))
        stats_out_spec = pl.BlockSpec((1, 2, Cout), lambda ci, ni: (ci, 0, 0))

        # ---- pass 1: global per-channel sum / sum-of-squares -----------------
        stats_parts = pl.pallas_call(
            functools.partial(_stats_kernel, nb=Nb, cin=Cin, cout=Cout,
                              OH=OH, OW=OW),
            out_shape=jax.ShapeDtypeStruct((NC, 2, Cout), jnp.float32),
            grid=(NC, NBC),
            in_specs=[x_spec1, w_spec1],
            out_specs=stats_out_spec,
            compiler_params=cparams,
        )(x_std, w_mat)
        stats = jnp.sum(stats_parts, axis=0)          # combine per-core partials

        # ---- pass 2: normalize + ReLU + fused 2x2 max-pool --------------------
        inv_m = 1.0 / float(N * OH * OW)
        out3 = pl.pallas_call(
            functools.partial(_norm_pool_kernel, nb=Nb, PH=PH, PW=PW, cin=Cin,
                              cout=Cout, inv_m=inv_m, eps=1e-5),
            out_shape=jax.ShapeDtypeStruct((NB, Nb * PH * PW, Cout), jnp.float32),
            grid=(NB,),
            in_specs=[pl.BlockSpec((Nb, HC, WC, 4 * Cin), lambda i: (i, 0, 0, 0)),
                      pl.BlockSpec((4 * Cin, Cout), lambda i: (0, 0)),
                      pl.BlockSpec((2, Cout), lambda i: (0, 0)),
                      pl.BlockSpec((1, Cout), lambda i: (0, 0)),
                      pl.BlockSpec((1, Cout), lambda i: (0, 0))],
            out_specs=pl.BlockSpec((1, Nb * PH * PW, Cout), lambda i: (i, 0, 0)),
            compiler_params=cparams_par,
        )(x_std, w_mat, stats,
          self.gamma.reshape(1, Cout), self.beta.reshape(1, Cout))

        # NHWC-flat -> NCHW for the PyTorch-facing contract.
        return out3.reshape(N, PH, PW, Cout).transpose(0, 3, 1, 2)


# ----------------------------------------------------------------------------
# Pure-JAX reference (for correctness check only)
# ----------------------------------------------------------------------------
def _reference(x, m: ConvPallas):
    y = lax.conv_general_dilated(
        x, m.w, window_strides=(1, 1),
        padding=[(m.pad, m.pad), (m.pad, m.pad)],
        dimension_numbers=("NCHW", "OIHW", "NCHW"))
    y = y + m.b[None, :, None, None]
    mean = jnp.mean(y, axis=(0, 2, 3), keepdims=True)
    var = jnp.mean((y - mean) ** 2, axis=(0, 2, 3), keepdims=True)
    y = (y - mean) * lax.rsqrt(var + 1e-5)
    y = y * m.gamma[None, :, None, None] + m.beta[None, :, None, None]
    y = jnp.maximum(y, 0.0)
    y = lax.reduce_window(y, -jnp.inf, lax.max,
                          (1, 1, m.k, m.k), (1, 1, m.k, m.k), "VALID")
    return y


if __name__ == "__main__":
    key = jax.random.PRNGKey(0)
    kx, kp = jax.random.split(key)

    # First block of the model: Conv(3, 32); small spatial 16x16, batch 2
    N, Cin, H, W = 2, 3, 16, 16
    Cout = 32
    x = jax.random.normal(kx, (N, Cin, H, W), jnp.float32)

    block = ConvPallas(Cin, Cout, kp)   # Conv2d(k=2,p=0) + BN + ReLU + MaxPool(2,2)
    out = jax.block_until_ready(block(x))

    ref = _reference(x, block)
    assert out.shape == ref.shape == (N, Cout, (H - 1) // 2, (W - 1) // 2), out.shape
    if not jnp.allclose(out, ref, atol=5e-2, rtol=5e-2):
        err = float(jnp.max(jnp.abs(out - ref)))
        raise AssertionError(
            f"Pallas output mismatch vs JAX reference (max |err| = {err})")
    print("KERNEL_OK")
</pallas_src>

<mosaic_0001>
module attributes {stable_mosaic.version = 11 : i64} {
  func.func @_stats_kernel(%arg0: i32, %arg1: i32, %arg2: memref<2x8x8x12xbf16, #tpu.memory_space<vmem>>, %arg3: memref<12x32xbf16, #tpu.memory_space<vmem>>, %arg4: memref<1x2x32xf32, #tpu.memory_space<vmem>>) attributes {dimension_semantics = [#tpu.dimension_semantics<parallel>, #tpu.dimension_semantics<arbitrary>], iteration_bounds = array<i64: 1, 1>, scalar_prefetch = 0 : i64, scratch_operands = 0 : i64, tpu.core_type = #tpu.core_type<tc>, window_params = [{transform_indices = @transform_0, window_bounds = array<i64: 2, 8, 8, 12>}, {pipeline_mode = #tpu.pipeline_mode<synchronous>, transform_indices = @transform_1, window_bounds = array<i64: 12, 32>}, {transform_indices = @transform_2, window_bounds = array<i64: 1, 2, 32>}]} {
    %c0_i32 = arith.constant 0 : i32
    %0 = arith.cmpi eq, %arg1, %c0_i32 : i32
    %1 = arith.extui %0 : i1 to i32
    %c0_i32_0 = arith.constant 0 : i32
    %2 = arith.cmpi ne, %1, %c0_i32_0 : i32
    scf.if %2 {
      %cst_75 = arith.constant 0.000000e+00 : f32
      %68 = vector.broadcast %cst_75 : f32 to vector<1x2x32xf32>
      %c0_76 = arith.constant 0 : index
      %c0_77 = arith.constant 0 : index
      %c0_78 = arith.constant 0 : index
      %69 = vector.load %arg4[%c0_76, %c0_77, %c0_78] : memref<1x2x32xf32, #tpu.memory_space<vmem>>, vector<1x2x32xf32>
      tpu.vector_store %arg4[%c0_76, %c0_77, %c0_78], %68 {strides = array<i32>} : memref<1x2x32xf32, #tpu.memory_space<vmem>>, vector<1x2x32xf32>,
    } else {
    }
    %cst = arith.constant 0.000000e+00 : f32
    %3 = vector.broadcast %cst : f32 to vector<1x32xf32>
    %cst_1 = arith.constant 0.000000e+00 : f32
    %4 = vector.broadcast %cst_1 : f32 to vector<1x32xf32>
    %c0 = arith.constant 0 : index
    %c0_2 = arith.constant 0 : index
    %c0_3 = arith.constant 0 : index
    %c0_4 = arith.constant 0 : index
    %5 = vector.load %arg2[%c0, %c0_2, %c0_3, %c0_4] : memref<2x8x8x12xbf16, #tpu.memory_space<vmem>>, vector<2x8x8x12xbf16>
    %6 = vector.shape_cast %5 : vector<2x8x8x12xbf16> to vector<128x12xbf16>
    %c0_5 = arith.constant 0 : index
    %c0_6 = arith.constant 0 : index
    %7 = vector.load %arg3[%c0_5, %c0_6] : memref<12x32xbf16, #tpu.memory_space<vmem>>, vector<12x32xbf16>
    %cst_7 = arith.constant dense<0.000000e+00> : vector<128x32xf32>
    %8 = tpu.matmul %6, %7, %cst_7 {dimension_numbers = #tpu.dot_dimension_numbers<[1], [0], [0], [1], [0, 0, 1, 1], [], []>} : vector<128x12xbf16>, vector<12x32xbf16>, vector<128x32xf32> -> vector<128x32xf32>
    %cst_8 = arith.constant dense<0.000000e+00> : vector<32xf32>
    %9 = vector.multi_reduction <add>, %8, %cst_8 [0] : vector<128x32xf32> to vector<32xf32>
    %10 = vector.shape_cast %9 : vector<32xf32> to vector<1x32xf32>
    %11 = arith.addf %3, %10 : vector<1x32xf32>
    %12 = arith.mulf %8, %8 : vector<128x32xf32>
    %cst_9 = arith.constant dense<0.000000e+00> : vector<32xf32>
    %13 = vector.multi_reduction <add>, %12, %cst_9 [0] : vector<128x32xf32> to vector<32xf32>
    %14 = vector.shape_cast %13 : vector<32xf32> to vector<1x32xf32>
    %15 = arith.addf %4, %14 : vector<1x32xf32>
    %c0_10 = arith.constant 0 : index
    %c0_11 = arith.constant 0 : index
    %c0_12 = arith.constant 0 : index
    %c3 = arith.constant 3 : index
    %16 = vector.load %arg2[%c0_10, %c0_11, %c0_12, %c3] : memref<2x8x8x12xbf16, #tpu.memory_space<vmem>>, vector<2x8x7x3xbf16>
    %c0_13 = arith.constant 0 : index
    %c0_14 = arith.constant 0 : index
    %c1 = arith.constant 1 : index
    %c0_15 = arith.constant 0 : index
    %17 = vector.load %arg2[%c0_13, %c0_14, %c1, %c0_15] : memref<2x8x8x12xbf16, #tpu.memory_space<vmem>>, vector<2x8x7x3xbf16>
    %c0_16 = arith.constant 0 : index
    %c0_17 = arith.constant 0 : index
    %c0_18 = arith.constant 0 : index
    %c9 = arith.constant 9 : index
    %18 = vector.load %arg2[%c0_16, %c0_17, %c0_18, %c9] : memref<2x8x8x12xbf16, #tpu.memory_space<vmem>>, vector<2x8x7x3xbf16>
    %c0_19 = arith.constant 0 : index
    %c0_20 = arith.constant 0 : index
    %c1_21 = arith.constant 1 : index
    %c6 = arith.constant 6 : index
    %19 = vector.load %arg2[%c0_19, %c0_20, %c1_21, %c6] : memref<2x8x8x12xbf16, #tpu.memory_space<vmem>>, vector<2x8x7x3xbf16>
    %20 = tpu.concatenate %16, %17, %18, %19 in 3 : vector<2x8x7x3xbf16>, vector<2x8x7x3xbf16>, vector<2x8x7x3xbf16>, vector<2x8x7x3xbf16> -> vector<2x8x7x12xbf16>
    %21 = vector.shape_cast %20 : vector<2x8x7x12xbf16> to vector<112x12xbf16>
    %c0_22 = arith.constant 0 : index
    %c0_23 = arith.constant 0 : index
    %22 = vector.load %arg3[%c0_22, %c0_23] : memref<12x32xbf16, #tpu.memory_space<vmem>>, vector<12x32xbf16>
    %cst_24 = arith.constant dense<0.000000e+00> : vector<112x32xf32>
    %23 = tpu.matmul %21, %22, %cst_24 {dimension_numbers = #tpu.dot_dimension_numbers<[1], [0], [0], [1], [0, 0, 1, 1], [], []>} : vector<112x12xbf16>, vector<12x32xbf16>, vector<112x32xf32> -> vector<112x32xf32>
    %cst_25 = arith.constant dense<0.000000e+00> : vector<32xf32>
    %24 = vector.multi_reduction <add>, %23, %cst_25 [0] : vector<112x32xf32> to vector<32xf32>
    %25 = vector.shape_cast %24 : vector<32xf32> to vector<1x32xf32>
    %26 = arith.addf %11, %25 : vector<1x32xf32>
    %27 = arith.mulf %23, %23 : vector<112x32xf32>
    %cst_26 = arith.constant dense<0.000000e+00> : vector<32xf32>
    %28 = vector.multi_reduction <add>, %27, %cst_26 [0] : vector<112x32xf32> to vector<32xf32>
    %29 = vector.shape_cast %28 : vector<32xf32> to vector<1x32xf32>
    %30 = arith.addf %15, %29 : vector<1x32xf32>
    %c0_27 = arith.constant 0 : index
    %c0_28 = arith.constant 0 : index
    %c0_29 = arith.constant 0 : index
    %c6_30 = arith.constant 6 : index
    %31 = vector.load %arg2[%c0_27, %c0_28, %c0_29, %c6_30] : memref<2x8x8x12xbf16, #tpu.memory_space<vmem>>, vector<2x7x8x3xbf16>
    %c0_31 = arith.constant 0 : index
    %c0_32 = arith.constant 0 : index
    %c0_33 = arith.constant 0 : index
    %c9_34 = arith.constant 9 : index
    %32 = vector.load %arg2[%c0_31, %c0_32, %c0_33, %c9_34] : memref<2x8x8x12xbf16, #tpu.memory_space<vmem>>, vector<2x7x8x3xbf16>
    %c0_35 = arith.constant 0 : index
    %c1_36 = arith.constant 1 : index
    %c0_37 = arith.constant 0 : index
    %c0_38 = arith.constant 0 : index
    %33 = vector.load %arg2[%c0_35, %c1_36, %c0_37, %c0_38] : memref<2x8x8x12xbf16, #tpu.memory_space<vmem>>, vector<2x7x8x3xbf16>
    %c0_39 = arith.constant 0 : index
    %c1_40 = arith.constant 1 : index
    %c0_41 = arith.constant 0 : index
    %c3_42 = arith.constant 3 : index
    %34 = vector.load %arg2[%c0_39, %c1_40, %c0_41, %c3_42] : memref<2x8x8x12xbf16, #tpu.memory_space<vmem>>, vector<2x7x8x3xbf16>
    %35 = tpu.concatenate %31, %32, %33, %34 in 3 : vector<2x7x8x3xbf16>, vector<2x7x8x3xbf16>, vector<2x7x8x3xbf16>, vector<2x7x8x3xbf16> -> vector<2x7x8x12xbf16>
    %36 = vector.shape_cast %35 : vector<2x7x8x12xbf16> to vector<112x12xbf16>
    %c0_43 = arith.constant 0 : index
    %c0_44 = arith.constant 0 : index
    %37 = vector.load %arg3[%c0_43, %c0_44] : memref<12x32xbf16, #tpu.memory_space<vmem>>, vector<12x32xbf16>
    %cst_45 = arith.constant dense<0.000000e+00> : vector<112x32xf32>
    %38 = tpu.matmul %36, %37, %cst_45 {dimension_numbers = #tpu.dot_dimension_numbers<[1], [0], [0], [1], [0, 0, 1, 1], [], []>} : vector<112x12xbf16>, vector<12x32xbf16>, vector<112x32xf32> -> vector<112x32xf32>
    %cst_46 = arith.constant dense<0.000000e+00> : vector<32xf32>
    %39 = vector.multi_reduction <add>, %38, %cst_46 [0] : vector<112x32xf32> to vector<32xf32>
    %40 = vector.shape_cast %39 : vector<32xf32> to vector<1x32xf32>
    %41 = arith.addf %26, %40 : vector<1x32xf32>
    %42 = arith.mulf %38, %38 : vector<112x32xf32>
    %cst_47 = arith.constant dense<0.000000e+00> : vector<32xf32>
    %43 = vector.multi_reduction <add>, %42, %cst_47 [0] : vector<112x32xf32> to vector<32xf32>
    %44 = vector.shape_cast %43 : vector<32xf32> to vector<1x32xf32>
    %45 = arith.addf %30, %44 : vector<1x32xf32>
    %c0_48 = arith.constant 0 : index
    %c0_49 = arith.constant 0 : index
    %c0_50 = arith.constant 0 : index
    %c9_51 = arith.constant 9 : index
    %46 = vector.load %arg2[%c0_48, %c0_49, %c0_50, %c9_51] : memref<2x8x8x12xbf16, #tpu.memory_space<vmem>>, vector<2x7x7x3xbf16>
    %c0_52 = arith.constant 0 : index
    %c0_53 = arith.constant 0 : index
    %c1_54 = arith.constant 1 : index
    %c6_55 = arith.constant 6 : index
    %47 = vector.load %arg2[%c0_52, %c0_53, %c1_54, %c6_55] : memref<2x8x8x12xbf16, #tpu.memory_space<vmem>>, vector<2x7x7x3xbf16>
    %c0_56 = arith.constant 0 : index
    %c1_57 = arith.constant 1 : index
    %c0_58 = arith.constant 0 : index
    %c3_59 = arith.constant 3 : index
    %48 = vector.load %arg2[%c0_56, %c1_57, %c0_58, %c3_59] : memref<2x8x8x12xbf16, #tpu.memory_space<vmem>>, vector<2x7x7x3xbf16>
    %c0_60 = arith.constant 0 : index
    %c1_61 = arith.constant 1 : index
    %c1_62 = arith.constant 1 : index
    %c0_63 = arith.constant 0 : index
    %49 = vector.load %arg2[%c0_60, %c1_61, %c1_62, %c0_63] : memref<2x8x8x12xbf16, #tpu.memory_space<vmem>>, vector<2x7x7x3xbf16>
    %50 = tpu.concatenate %46, %47, %48, %49 in 3 : vector<2x7x7x3xbf16>, vector<2x7x7x3xbf16>, vector<2x7x7x3xbf16>, vector<2x7x7x3xbf16> -> vector<2x7x7x12xbf16>
    %51 = vector.shape_cast %50 : vector<2x7x7x12xbf16> to vector<98x12xbf16>
    %c0_64 = arith.constant 0 : index
    %c0_65 = arith.constant 0 : index
    %52 = vector.load %arg3[%c0_64, %c0_65] : memref<12x32xbf16, #tpu.memory_space<vmem>>, vector<12x32xbf16>
    %cst_66 = arith.constant dense<0.000000e+00> : vector<98x32xf32>
    %53 = tpu.matmul %51, %52, %cst_66 {dimension_numbers = #tpu.dot_dimension_numbers<[1], [0], [0], [1], [0, 0, 1, 1], [], []>} : vector<98x12xbf16>, vector<12x32xbf16>, vector<98x32xf32> -> vector<98x32xf32>
    %cst_67 = arith.constant dense<0.000000e+00> : vector<32xf32>
    %54 = vector.multi_reduction <add>, %53, %cst_67 [0] : vector<98x32xf32> to vector<32xf32>
    %55 = vector.shape_cast %54 : vector<32xf32> to vector<1x32xf32>
    %56 = arith.addf %41, %55 : vector<1x32xf32>
    %57 = arith.mulf %53, %53 : vector<98x32xf32>
    %cst_68 = arith.constant dense<0.000000e+00> : vector<32xf32>
    %58 = vector.multi_reduction <add>, %57, %cst_68 [0] : vector<98x32xf32> to vector<32xf32>
    %59 = vector.shape_cast %58 : vector<32xf32> to vector<1x32xf32>
    %60 = arith.addf %45, %59 : vector<1x32xf32>
    %c0_69 = arith.constant 0 : index
    %c0_70 = arith.constant 0 : index
    %c0_71 = arith.constant 0 : index
    %61 = vector.load %arg4[%c0_69, %c0_70, %c0_71] : memref<1x2x32xf32, #tpu.memory_space<vmem>>, vector<1x2x32xf32>
    %62 = vector.shape_cast %61 : vector<1x2x32xf32> to vector<2x32xf32>
    %63 = tpu.concatenate %56, %60 in 0 : vector<1x32xf32>, vector<1x32xf32> -> vector<2x32xf32>
    %64 = arith.addf %62, %63 : vector<2x32xf32>
    %c0_72 = arith.constant 0 : index
    %c0_73 = arith.constant 0 : index
    %c0_74 = arith.constant 0 : index
    %65 = vector.load %arg4[%c0_72, %c0_73, %c0_74] : memref<1x2x32xf32, #tpu.memory_space<vmem>>, vector<1x2x32xf32>
    %66 = vector.shape_cast %65 : vector<1x2x32xf32> to vector<2x32xf32>
    %67 = vector.shape_cast %64 : vector<2x32xf32> to vector<1x2x32xf32>
    tpu.vector_store %arg4[%c0_72, %c0_73, %c0_74], %67 {strides = array<i32>} : memref<1x2x32xf32, #tpu.memory_space<vmem>>, vector<1x2x32xf32>,
    return
  }
  func.func @transform_0(%arg0: i32, %arg1: i32) -> (i32, i32, i32, i32) {
    %c1_i32 = arith.constant 1 : i32
    %0 = arith.muli %arg0, %c1_i32 : i32
    %1 = arith.addi %0, %arg1 : i32
    %c0_i32 = arith.constant 0 : i32
    %c0_i32_0 = arith.constant 0 : i32
    %c0_i32_1 = arith.constant 0 : i32
    %c0_i32_2 = arith.constant 0 : i32
    return %1, %c0_i32, %c0_i32_0, %c0_i32_1 : i32, i32, i32, i32
  }
  func.func @transform_1(%arg0: i32, %arg1: i32) -> (i32, i32) {
    %c0_i32 = arith.constant 0 : i32
    %c0_i32_0 = arith.constant 0 : i32
    %c0_i32_1 = arith.constant 0 : i32
    return %c0_i32, %c0_i32_0 : i32, i32
  }
  func.func @transform_2(%arg0: i32, %arg1: i32) -> (i32, i32, i32) {
    %c0_i32 = arith.constant 0 : i32
    %c0_i32_0 = arith.constant 0 : i32
    %c0_i32_1 = arith.constant 0 : i32
    return %arg0, %c0_i32, %c0_i32_0 : i32, i32, i32
  }
}

</mosaic_0001>

<bundles_post_ra>
// kernel: tpu_custom_call.1
= control target key start
LH: loop header
LB: loop body
LE: loop exit
PB: predicated region body
PF: predicated region fallthrough
CT: control target
= control target key end

     0   :  { %7 = vsyncpa [#allocation3], 0  ;;  %s5066_s0 = inlined_call_operand.hbm [shape: bf16[2,8,8,12], index: 0, kind: input, shape index: {}]   ;;  %s5067_s1 = inlined_call_operand.hbm [shape: bf16[12,32], index: 1, kind: input, shape index: {}]   ;;  %s5068_s2 = inlined_call_operand.hbm [shape: f32[1,2,32], index: 2, kind: output, shape index: {}]  }
   0x1   :  { %8 = vsyncpa [#allocation6], 0 }
   0x2   :  { %9 = vsyncpa [#allocation4], 0  ;;  %s4020_s9 = smov [#allocation2]  }
   0x3   :  { %s20_s10 = sshll.u32 %s4020_s9, 4  ;;  %s21_s10 = int_to_ptr.vmem [resolvable:$true] %s20_s10 }
   0x4   :  { %s3962_s11 = scalar_lea.vmem %s21_s10, 1024  ;;  %p3967_p1 = scmp.lt.s32.totalorder %s21_s10, %s21_s10 }
   0x5   :  { %p3963_p0 = scmp.ne.s32.totalorder %s21_s10, %s3962_s11  ;;  %p3968_p2 = scmp.lt.s32.totalorder %s3962_s11, %s3962_s11 }
   0x7   :  { %p3969_p3 = por %p3968_p2, %p3967_p1 }
   0x9   :  { %p3970_p4 = pnand %p3969_p3, %p3963_p0 }
   0xb   :  { %3973 = shalt.err (!%p3970_p4)
}
   0xc   :  { %s4021_s12 = smov 64   ;;  %s4022_s13 = smov 4  }
   0xd   :  { %26 = dma.hbm_to_vmem [thread:$0]  %s5066_s0, 1024, %s21_s10, [#allocation3], %s4021_s12, %s4021_s12, %s4022_s13  }
   0xe   :  { %s4023_s16 = smov [#allocation5]  }
   0xf   :  { %s32_s17 = sshll.u32 %s4023_s16, 4  ;;  %s33_s17 = int_to_ptr.vmem [resolvable:$true] %s32_s17 }
  0x10   :  { %s3982_s18 = scalar_lea.vmem %s33_s17, 128  ;;  %p3987_p6 = scmp.lt.s32.totalorder %s33_s17, %s33_s17 }
  0x11   :  { %p3983_p5 = scmp.ne.s32.totalorder %s33_s17, %s3982_s18  ;;  %p3988_p7 = scmp.lt.s32.totalorder %s3982_s18, %s3982_s18 }
  0x13   :  { %p3989_p8 = por %p3988_p7, %p3987_p6 }
  0x15   :  { %p3990_p9 = pnand %p3989_p8, %p3983_p5 }
  0x17   :  { %3993 = shalt.err (!%p3990_p9)
}
  0x18   :  { %38 = dma.hbm_to_vmem [thread:$0]  %s5067_s1, 128, %s33_s17, [#allocation6], %s4021_s12, %s4021_s12, %s4022_s13  }
  0x19   :  { %4014 = dma.done.wait [#allocation3], 1024  }
  0x1a   :  { %4015 = vsyncadd [#allocation3], 4294966272 }
  0x1b   :  { %4016 = dma.done.wait [#allocation6], 128  }
  0x1c   :  { %4017 = vsyncadd [#allocation6], 4294967168  ;;  %v4055_v0 = vld [vmem:[#allocation2 + $0x8] sm:$0xf]  ;;  %v4057_v1 = vld [vmem:[#allocation2 + $0xc] sm:$0xf] }
  0x1d   :  { %v4059_v2 = vld [vmem:[#allocation2 + $0x10] sm:$0xf]  ;;  %v3604_v3 = vcombine.low %v4055_v0, %v4055_v0  ;;  %v3605_v4 = vcombine.low %v4057_v1, %v4057_v1  ;;  %v4067_v6 = vld [vmem:[#allocation2 + $0x14] sm:$0xf]  ;;  %s4024_s0 = smov 125   ;;  %s4025_s1 = smov 3  }
  0x1e   :  { %v3606_v5 = vcombine.low %v4059_v2, %v4059_v2  ;;  %v3607_v10 = vcombine.low %v4067_v6, %v4067_v6  ;;  %v4072_v15 = vld [vmem:[#allocation2 + $0x18] sm:$0xf]  ;;  %v4077_v18 = vld [vmem:[#allocation2 + $0x1c] sm:$0xf]  ;;  %v4084_v28 = vld [vmem:[#allocation2 + $0x20] sm:$0xf] }
  0x1f   :  { %356 = vrot.lane.b32.xlu0 %v3604_v3, %s4024_s0  ;;  %v399_v7 = vshrl.u32 %v3604_v3, 16  ;;  %v401_v8 = vshll.u32 %v3604_v3, 16  ;;  %v408_v9 = vshll.u32 %v3605_v4, 16  ;;  %v406_v12 = vshrl.u32 %v3605_v4, 16  ;;  %v4090_v34 = vld [vmem:[#allocation2 + $0x24] sm:$0xf] }
  0x20   :  { %v415_v14 = vshll.u32 %v3606_v5, 16  ;;  %v3608_v17 = vcombine.low %v4072_v15, %v4072_v15  ;;  %v413_v20 = vshrl.u32 %v3606_v5, 16  ;;  %v422_v22 = vshll.u32 %v3607_v10, 16  ;;  %v4096_v40 = vld [vmem:[#allocation2 + $0x28] sm:$0xf]  ;;  %s4028_s21 = smov 119  }
  0x21   :  { %v403_v11 = vrot.slane %v401_v8, 1  ;;  %v410_v13 = vrot.slane %v408_v9, 1  ;;  %v3609_v23 = vcombine.low %v4077_v18, %v4077_v18  ;;  %v420_v25 = vshrl.u32 %v3607_v10, 16  ;;  %v4102_v46 = vld [vmem:[#allocation2 + $0x2c] sm:$0xf]  ;;  %s4029_s22 = smov 9  }
  0x22   :  { %v417_v21 = vrot.slane %v415_v14, 1  ;;  %v424_v26 = vrot.slane %v422_v22, 1  ;;  %v429_v27 = vshll.u32 %v3608_v17, 16  ;;  %v427_v31 = vshrl.u32 %v3608_v17, 16  ;;  %v4107_v48 = vld [vmem:[#allocation2 + $0x30] sm:$0xf] }
  0x23   :  { %358 = vrot.lane.b32.xlu0 %v3605_v4, %s4024_s0  ;;  %v404_v16 = vor.u32 %v403_v11, %v399_v7  ;;  %v411_v19 = vor.u32 %v410_v13, %v406_v12  ;;  %v436_v29 = vshll.u32 %v3609_v23, 16  ;;  %v3610_v33 = vcombine.low %v4084_v28, %v4084_v28  ;;  %v4114_v58 = vld [vmem:[#allocation2 + $0x34] sm:$0xf]  ;;  %v54_v60 = vld [vmem:[#allocation2] sm:$0xf]  ;;  %s4030_s23 = smov 122  }
  0x24   :  { %v418_v24 = vor.u32 %v417_v21, %v413_v20  ;;  %v425_v30 = vor.u32 %v424_v26, %v420_v25  ;;  %v431_v32 = vrot.slane %v429_v27, 1  ;;  %v434_v35 = vshrl.u32 %v3609_v23, 16  ;;  %v3932_v61 = vld [vmem:[#allocation5] sm:$0x3f]   ;;  %v4136_v20 = vld [vmem:[#allocation2 + $0x38] sm:$0xf] }
  0x25   :  { %500 = vrot.lane.b32.xlu1 %v404_v16, %s4025_s1  ;;  %v438_v36 = vrot.slane %v436_v29, 1  ;;  %v3611_v38 = vcombine.low %v4090_v34, %v4090_v34  ;;  %v443_v39 = vshll.u32 %v3610_v33, 16  ;;  %v441_v42 = vshrl.u32 %v3610_v33, 16  ;;  %v55_v13 = vld [vmem:[#allocation2 + $0x4] sm:$0xf]  ;;  %s4031_s24 = smov 6  }
  0x26   :  { %v432_v37 = vor.u32 %v431_v32, %v427_v31  ;;  %v3612_v44 = vcombine.low %v4096_v40, %v4096_v40  ;;  %v3613_v47 = vcombine.low %v4102_v46, %v4102_v46  ;;  %v3614_v53 = vcombine.low %v4107_v48, %v4107_v48  ;;  %v69_v26 = vld [vmem:[#allocation2 + $0x3c] sm:$0xf]  ;;  %s4033_s25 = smov [#allocation7]  }
  0x27   :  { %360 = vrot.lane.b32.xlu0 %v3606_v5, %s4024_s0  ;;  %v439_v41 = vor.u32 %v438_v36, %v434_v35  ;;  %v445_v43 = vrot.slane %v443_v39, 1  ;;  %v450_v45 = vshll.u32 %v3611_v38, 16  ;;  %v448_v50 = vshrl.u32 %v3611_v38, 16  ;;  %s3575_s26 = sshll.u32 %s4033_s25, 4  ;;  %s3576_s26 = int_to_ptr.vmem [resolvable:$true] %s3575_s26 }
  0x28   :  { %v457_v52 = vshll.u32 %v3612_v44, 16  ;;  %v455_v55 = vshrl.u32 %v3612_v44, 16  ;;  %v464_v57 = vshll.u32 %v3613_v47, 16  ;;  %v471_v59 = vshll.u32 %v3614_v53, 16  ;;  %s3994_s27 = scalar_lea.vmem %s3576_s26, 32  ;;  %p3999_p11 = scmp.lt.s32.totalorder %s3576_s26, %s3576_s26 }
  0x29   :  { %502 = vrot.lane.b32.xlu1 %v411_v19, %s4025_s1  ;;  %v446_v49 = vor.u32 %v445_v43, %v441_v42  ;;  %v452_v51 = vrot.slane %v450_v45, 1  ;;  %vm142_vm0 = vcmask 1045504   ;;  %v462_v63 = vshrl.u32 %v3613_v47, 16  ;;  %p3995_p10 = scmp.ne.s32.totalorder %s3576_s26, %s3994_s27  ;;  %p4000_p12 = scmp.lt.s32.totalorder %s3994_s27, %s3994_s27 }
  0x2a   :  { %v459_v56 = vrot.slane %v457_v52, 1  ;;  %v466_v3 = vrot.slane %v464_v57, 1  ;;  %v3615_v4 = vcombine.low %v4114_v58, %v4114_v58  ;;  %v4026_v5 = vmov 0.0   ;;  %3877 = vmatprep.subr.msk.bf16.mxu0 %vm142_vm0, %v3932_v61 }
  0x2b   :  { %362 = vrot.lane.b32.xlu0 %v3607_v10, %s4024_s0  ;;  %v453_v54 = vor.u32 %v452_v51, %v448_v50  ;;  %3875 = vmatprep.subr.bf16.mxu1 %v4026_v5  ;;  %v4121_v7 = vsel %vm142_vm0, %v3932_v61, 0  ;;  %v469_v8 = vshrl.u32 %v3614_v53, 16  ;;  %v473_v9 = vrot.slane %v471_v59, 1  ;;  %v4197_v61 = vld [vmem:[#allocation2 + $0xc] ss:$0 sps:$4 sm:$0xff]   ;;  %p4001_p13 = por %p4000_p12, %p3999_p11 }
  0x2c   :  { %v460_v62 = vor.u32 %v459_v56, %v455_v55  ;;  %v3602_v10 = vcombine.low %v54_v60, %v54_v60  ;;  %3876 = vmatpush3.bf16.msra.mxu1 %v4121_v7  ;;  %vm4027_vm1 = vmmov 0   ;;  %3768 = vmatpush3.bf16.msra.mxu0 %v4121_v7  ;;  %v467_v11 = vor.u32 %v466_v3, %v462_v63 }
  0x2d   :  { %504 = vrot.lane.b32.xlu1 %v418_v24, %s4025_s1  ;;  %3791 = vmatprep.mubr.msk.bf16.mxu1 %vm4027_vm1, %v4026_v5  ;;  %v478_v12 = vshll.u32 %v3615_v4, 16  ;;  %v3586_v14 = vcombine.low %v4055_v0, %v4057_v1  ;;  %v474_v16 = vor.u32 %v473_v9, %v469_v8  ;;  %v3587_v19 = vcombine.low %v4059_v2, %v4067_v6  ;;  %p4002_p0 = pnand %p4001_p13, %p3995_p10 }
  0x2e   :  { %3785 = vmatprep.subr.bf16.mxu0 %v4026_v5  ;;  %3845 = vmatprep.subr.bf16.mxu1 %v4026_v5  ;;  %v3585_v21 = vcombine.low %v54_v60, %v55_v13  ;;  %v476_v22 = vshrl.u32 %v3615_v4, 16  ;;  %v3603_v24 = vcombine.low %v55_v13, %v55_v13  ;;  %vm117_vm2 = vcmask 97280  }
  0x2f   :  { %364 = vrot.lane.b32.xlu0 %v3608_v17, %s4024_s0  ;;  %v387_v17 = vshll.u32 %v3602_v10, 16  ;;  %v385_v0 = vshrl.u32 %v3602_v10, 16  ;;  %v3616_v25 = vcombine.low %v4136_v20, %v4136_v20  ;;  %v3588_v27 = vcombine.low %v4072_v15, %v4077_v18 }
  0x30   :  { %3769 = vmatprep.mubr.msk.bf16.mxu0 %vm117_vm2, %v3585_v21  ;;  %v394_v6 = vshll.u32 %v3603_v24, 16  ;;  %v3589_v31 = vcombine.low %v4084_v28, %v4090_v34  ;;  %v392_v32 = vshrl.u32 %v3603_v24, 16  ;;  %v3617_v35 = vcombine.low %v69_v26, %v69_v26 }
  0x31   :  { %506 = vrot.lane.b32.xlu1 %v425_v30, %s4025_s1  ;;  %v389_v1 = vrot.slane %v387_v17, 1  ;;  %3770 = vmatmul.mubr.msk.bf16.vlgmr.msra.gmra.mxu0 %vm117_vm2, %v3586_v14  ;;  %v485_v30 = vshll.u32 %v3616_v25, 16  ;;  %v483_v36 = vshrl.u32 %v3616_v25, 16  ;;  %v3590_v28 = vcombine.low %v4096_v40, %v4102_v46  ;;  %v4171_v40 = vld [vmem:[#allocation2 + $0x4] ss:$0 sps:$4 sm:$0xff]  }
  0x32   :  { %3773 = vmatprep.mubr.msk.bf16.mxu0 %vm117_vm2, %v3587_v19  ;;  %3786 = vmatpush3.bf16.msra.mxu0 %v4121_v7  ;;  %v492_v18 = vshll.u32 %v3617_v35, 16  ;;  %v490_v42 = vshrl.u32 %v3617_v35, 16  ;;  %v2351_v51 = vshll.u32 %v4171_v40, 16  ;;  %v2349_v55 = vshrl.u32 %v4171_v40, 16 }
  0x33   :  { %366 = vrot.lane.b32.xlu0 %v3609_v23, %s4024_s0  ;;  %v480_v23 = vrot.slane %v478_v12, 1  ;;  %3815 = vmatprep.subr.bf16.mxu0 %v4026_v5  ;;  %v390_v29 = vor.u32 %v389_v1, %v385_v0  ;;  %v2216_v12 = vshrl.u32 %v4197_v61, 16  ;;  %vm528_vm3 = vcmask 23552  }
  0x34   :  { %v494_v43 = vrot.slane %v492_v18, 1  ;;  %v2353_v56 = vrot.slane %v2351_v51, 1  ;;  %v4258_v18 = vld [vmem:[#allocation2 + $0x20] ss:$0 sps:$4 sm:$0xff]   ;;  %vm577_vm4 = vcmask 48128   ;;  %vm594_vm5 = vcmask 72704  }
  0x35   :  { %508 = vrot.lane.b32.xlu1 %v432_v37, %s4025_s1  ;;  %v481_v2 = vor.u32 %v480_v23, %v476_v22  ;;  %v487_v37 = vrot.slane %v485_v30, 1  ;;  %v4220_v22 = vld [vmem:[#allocation2 + $0x10] ss:$0 sps:$4 sm:$0xff]   ;;  %v4239_v30 = vld [vmem:[#allocation2 + $0x14] ss:$0 sps:$4 sm:$0xff]   ;;  %vm243_vm6 = vcmask 261120  }
  0x36   :  { %v495_v46 = vor.u32 %v494_v43, %v490_v42  ;;  %v2354_v60 = vor.u32 %v2353_v56, %v2349_v55  ;;  %v630_v42 = vlaneseq  ;;  %v4261_v43 = vld [vmem:[#allocation2 + $0x24] ss:$0 sps:$4 sm:$0xff]   ;;  %vm52_vm7 = vcmask 254976  }
  0x37   :  { %510 = vrot.lane.b32.xlu0 %v439_v41, %s4025_s1  ;;  %v488_v34 = vor.u32 %v487_v37, %v483_v36  ;;  %v3591_v41 = vcombine.low %v4107_v48, %v4114_v58  ;;  %v4192_v58 = vld [vmem:[#allocation2 + $0x8] ss:$0 sps:$4 sm:$0xff]   ;;  %v4251_v37 = vld [vmem:[#allocation2 + $0x18] ss:$0 sps:$4 sm:$0xff]   ;;  %53 = vst.msk [vmem:[#allocation7] sm:$0x3] %vm52_vm7, %v4026_v5 }
  0x38   :  { %v2211_v3 = vshll.u32 %v4192_v58, 16  ;;  %v2209_v9 = vshrl.u32 %v4192_v58, 16  ;;  %v631_v55 = vshrl.u32 %v630_v42, 7  ;;  %v2237_v56 = vshrl.u32 %v4251_v37, 16 }
  0x39   :  { %368 = vrot.lane.b32.xlu1 %v3610_v33, %s4024_s0  ;;  %v396_v33 = vrot.slane %v394_v6, 1  ;;  %3774 = vmatmul.mubr.msk.bf16.gmra.mxu0 %vm117_vm2, %v3588_v27  ;;  %v2223_v6 = vshrl.u32 %v4220_v22, 16  ;;  %vm3565_vm8 = vcmask 1040384  }
  0x3a   :  { %3777 = vmatprep.mubr.msk.bf16.mxu0 %vm117_vm2, %v3589_v31 }
  0x3b   :  { %370 = vrot.lane.b32.xlu0 %v3611_v38, %s4024_s0  ;;  %v4155_v38 = vld [vmem:[#allocation2] ss:$0 sps:$4 sm:$0xff]   ;;  %v397_v15 = vor.u32 %v396_v33, %v392_v32  ;;  %v4245_v32 = vld [vmem:[#allocation2 + $0x18] ss:$0 sps:$4 sm:$0xff]   ;;  %v2232_v33 = vshll.u32 %v4239_v30, 16 }
  0x3c   :  { %v2197_v39 = vshll.u32 %v4155_v38, 16  ;;  %v2195_v45 = vshrl.u32 %v4155_v38, 16 }
  0x3d   :  { %512 = vrot.lane.b32.xlu1 %v446_v49, %s4025_s1  ;;  %v3592_v49 = vcombine.low %v4136_v20, %v69_v26 }
  0x3f   :  { %372 = vrot.lane.b32.xlu0 %v3612_v44, %s4024_s0  ;;  %v4167_v44 = vld [vmem:[#allocation2 + $0x4] ss:$0 sps:$4 sm:$0xff]  }
  0x40   :  { %v2204_v48 = vshll.u32 %v4167_v44, 16  ;;  %v2202_v52 = vshrl.u32 %v4167_v44, 16 }
  0x41   :  { %514 = vrot.lane.b32.xlu1 %v453_v54, %s4025_s1  ;;  %3778 = vmatmul.mubr.msk.bf16.gmra.mxu0 %vm117_vm2, %v3590_v28  ;;  %v4183_v54 = vld [vmem:[#allocation2 + $0x8] ss:$0 sps:$4 sm:$0xff]   ;;  %v2230_v28 = vshrl.u32 %v4239_v30, 16 }
  0x42   :  { %3781 = vmatprep.mubr.msk.bf16.mxu0 %vm117_vm2, %v3591_v41  ;;  %v2358_v59 = vshll.u32 %v4183_v54, 16 }
  0x43   :  { %374 = vrot.lane.b32.xlu0 %v3613_v47, %s4024_s0  ;;  %v2199_v47 = vrot.slane %v2197_v39, 1  ;;  %v4032_v39 = vmov 1966171168  }
  0x44   :  { %v2360_v63 = vrot.slane %v2358_v59, 1  ;;  %v628_v41 = vunpack.c.l.s4 %v4032_v39 }
  0x45   :  { %516 = vrot.lane.b32.xlu1 %v460_v62, %s4025_s1  ;;  %v2200_v50 = vor.u32 %v2199_v47, %v2195_v45  ;;  %v2356_v62 = vshrl.u32 %v4183_v54, 16  ;;  %v4265_v45 = vld [vmem:[#allocation2 + $0x24] ss:$0 sps:$4 sm:$0xff]   ;;  %v4267_v47 = vld [vmem:[#allocation2 + $0x28] ss:$0 sps:$4 sm:$0xff]  }
  0x47   :  { %376 = vrot.lane.b32.xlu0 %v3614_v53, %s4024_s0  ;;  %v2206_v53 = vrot.slane %v2204_v48, 1  ;;  %v2361_v8 = vor.u32 %v2360_v63, %v2356_v62  ;;  %v4272_v48 = vld [vmem:[#allocation2 + $0x2c] ss:$0 sps:$4 sm:$0xff]   ;;  %v2400_v62 = vshll.u32 %v4265_v45, 16  ;;  %v2407_v63 = vshll.u32 %v4267_v47, 16 }
  0x49   :  { %518 = vrot.lane.b32.xlu1 %v467_v11, %s4025_s1  ;;  %3782 = vmatmul.mubr.msk.bf16.gmra.mxu0 %vm117_vm2, %v3592_v49  ;;  %v2207_v57 = vor.u32 %v2206_v53, %v2202_v52  ;;  %v4209_v11 = vld [vmem:[#allocation2 + $0xc] ss:$0 sps:$4 sm:$0xff]   ;;  %v2384_v49 = vshrl.u32 %v4245_v32, 16  ;;  %v2246_v52 = vshll.u32 %v4258_v18, 16 }
  0x4a   :  { %3787 = vmatprep.mubr.msk.bf16.mxu0 %vm4027_vm1, %v4026_v5  ;;  %v2365_v17 = vshll.u32 %v4209_v11, 16  ;;  %v2363_v20 = vshrl.u32 %v4209_v11, 16  ;;  %v4279_v53 = vld [vmem:[#allocation2 + $0x2c] ss:$0 sps:$4 sm:$0xff]  }
  0x4b   :  { %520 = vrot.lane.b32.xlu0 %v474_v16, %s4025_s1  ;;  %v4213_v16 = vld [vmem:[#allocation2 + $0x10] ss:$0 sps:$4 sm:$0xff]   ;;  %v2265_v39 = vshrl.u32 %v4279_v53, 16 }
  0x4c   :  { %v2367_v21 = vrot.slane %v2365_v17, 1  ;;  %v2372_v23 = vshll.u32 %v4213_v16, 16  ;;  %v2370_v0 = vshrl.u32 %v4213_v16, 16  ;;  %v2267_v17 = vshll.u32 %v4279_v53, 16 }
  0x4d   :  { %378 = vrot.lane.b32.xlu1 %v3615_v4, %s4024_s0  ;;  %v2218_v4 = vshll.u32 %v4197_v61, 16 }
  0x4e   :  { %v2374_v1 = vrot.slane %v2372_v23, 1  ;;  %v2398_v23 = vshrl.u32 %v4265_v45, 16 }
  0x4f   :  { %352 = vrot.lane.b32.xlu0 %v3602_v10, %s4024_s0  ;;  %v2213_v10 = vrot.slane %v2211_v3, 1  ;;  %v2220_v13 = vrot.slane %v2218_v4, 1 }
  0x51   :  { %522 = vrot.lane.b32.xlu1 %v481_v2, %s4025_s1  ;;  %v2214_v14 = vor.u32 %v2213_v10, %v2209_v9  ;;  %v2221_v19 = vor.u32 %v2220_v13, %v2216_v12  ;;  %v2375_v2 = vor.u32 %v2374_v1, %v2370_v0  ;;  %v2244_v9 = vshrl.u32 %v4258_v18, 16 }
  0x52   :  { %v2414_v10 = vshll.u32 %v4272_v48, 16  ;;  %v2402_v1 = vrot.slane %v2400_v62, 1 }
  0x53   :  { %496 = vrot.lane.b32.xlu0 %v390_v29, %s4025_s1  ;;  %v4235_v29 = vld [vmem:[#allocation2 + $0x14] ss:$0 sps:$4 sm:$0xff]  }
  0x54   :  { %v2379_v31 = vshll.u32 %v4235_v29, 16 }
  0x55   :  { %354 = vrot.lane.b32.xlu1 %v3603_v24, %s4024_s0  ;;  %v2368_v24 = vor.u32 %v2367_v21, %v2363_v20  ;;  %v2251_v20 = vshrl.u32 %v4261_v43, 16 }
  0x56   :  { %v2381_v36 = vrot.slane %v2379_v31, 1 }
  0x57   :  { %380 = vrot.lane.b32.xlu0 %v3616_v25, %s4024_s0  ;;  %v2225_v25 = vshll.u32 %v4220_v22, 16 }
  0x59   :  { %498 = vrot.lane.b32.xlu1 %v397_v15, %s4025_s1  ;;  %v2227_v26 = vrot.slane %v2225_v25, 1  ;;  %v4256_v15 = vld [vmem:[#allocation2 + $0x1c] ss:$0 sps:$4 sm:$0xff]   ;;  %v2409_v25 = vrot.slane %v2407_v63, 1 }
  0x5a   :  { %v2393_v51 = vshll.u32 %v4256_v15, 16 }
  0x5b   :  { %524 = vrot.lane.b32.xlu0 %v488_v34, %s4025_s1  ;;  %v2228_v27 = vor.u32 %v2227_v26, %v2223_v6  ;;  %v2234_v34 = vrot.slane %v2232_v33, 1  ;;  %v4300_v26 = vld [vmem:[#allocation2 + $0x34] ss:$0 sps:$4 sm:$0xff]   ;;  %v2412_v33 = vshrl.u32 %v4272_v48, 16 }
  0x5c   :  { %v2395_v13 = vrot.slane %v2393_v51, 1  ;;  %v4321_v51 = vld [vmem:[#allocation2 + $0x38] ss:$0 sps:$4 sm:$0xff]  }
  0x5d   :  { %382 = vrot.lane.b32.xlu1 %v3617_v35, %s4024_s0  ;;  %v2377_v35 = vshrl.u32 %v4235_v29, 16 }
  0x5f   :  { %2166 = vrot.lane.b32.xlu0 %v4155_v38, %s4028_s21 }
  0x61   :  { %526 = vrot.lane.b32.xlu1 %v495_v46, %s4025_s1  ;;  %v2239_v46 = vshll.u32 %v4251_v37, 16 }
  0x63   :  { %2292 = vrot.lane.b32.xlu0 %v2200_v50, %s4024_s0  ;;  %v2241_v4 = vrot.slane %v2239_v46, 1 }
  0x65   :  { %2168 = vrot.lane.b32.xlu1 %v4167_v44, %s4028_s21  ;;  %v2242_v31 = vor.u32 %v2241_v4, %v2237_v56 }
  0x67   :  { %2320 = vrot.lane.b32.xlu0 %v4171_v40, %s4025_s1 }
  0x69   :  { %2294 = vrot.lane.b32.xlu1 %v2207_v57, %s4024_s0  ;;  %v2253_v57 = vshll.u32 %v4261_v43, 16 }
  0x6b   :  { %2446 = vrot.lane.b32.xlu0 %v2354_v60, %s4029_s22  ;;  %v2235_v60 = vor.u32 %v2234_v34, %v2230_v28  ;;  %v2255_v21 = vrot.slane %v2253_v57, 1  ;;  %v2428_v57 = vshll.u32 %v4300_v26, 16 }
  0x6d   :  { %2322 = vrot.lane.b32.xlu1 %v4183_v54, %s4025_s1 }
  0x6f   :  { %2170 = vrot.lane.b32.xlu0 %v4192_v58, %s4028_s21 }
  0x71   :  { %2448 = vrot.lane.b32.xlu1 %v2361_v8, %s4029_s22  ;;  %v2391_v8 = vshrl.u32 %v4256_v15, 16 }
  0x73   :  { %2324 = vrot.lane.b32.xlu0 %v4209_v11, %s4025_s1  ;;  %v4311_v34 = vor.u32 %v2395_v13, %v2391_v8 }
  0x75   :  { %2296 = vrot.lane.b32.xlu1 %v2214_v14, %s4024_s0  ;;  %v2248_v14 = vrot.slane %v2246_v52, 1 }
  0x77   :  { %2298 = vrot.lane.b32.xlu0 %v2221_v19, %s4024_s0  ;;  %v4293_v19 = vld [vmem:[#allocation2 + $0x30] ss:$0 sps:$4 sm:$0xff]   ;;  %v4316_v46 = vor.u32 %v2248_v14, %v2244_v9 }
  0x78   :  { %v2274_v42 = vshll.u32 %v4293_v19, 16  ;;  %v2272_v9 = vshrl.u32 %v4293_v19, 16 }
  0x79   :  { %2172 = vrot.lane.b32.xlu1 %v4197_v61, %s4028_s21 }
  0x7b   :  { %2326 = vrot.lane.b32.xlu0 %v4213_v16, %s4025_s1 }
  0x7d   :  { %2450 = vrot.lane.b32.xlu1 %v2368_v24, %s4029_s22  ;;  %v2405_v24 = vshrl.u32 %v4267_v47, 16 }
  0x7f   :  { %2174 = vrot.lane.b32.xlu0 %v4220_v22, %s4028_s21  ;;  %v4327_v56 = vor.u32 %v2409_v25, %v2405_v24 }
  0x81   :  { %2452 = vrot.lane.b32.xlu1 %v2375_v2, %s4029_s22 }
  0x83   :  { %1785 = vrot.lane.b32.xlu0 %v4155_v38, %s4030_s23  ;;  %v2386_v38 = vshll.u32 %v4245_v32, 16 }
  0x85   :  { %2300 = vrot.lane.b32.xlu1 %v2228_v27, %s4024_s0  ;;  %v2388_v50 = vrot.slane %v2386_v38, 1  ;;  %v4307_v38 = vld [vmem:[#allocation2 + $0x34] ss:$0 sps:$4 sm:$0xff]  }
  0x87   :  { %1855 = vrot.lane.b32.xlu0 %v4171_v40, %s4031_s24  ;;  %v4269_v40 = vld [vmem:[#allocation2 + $0x28] ss:$0 sps:$4 sm:$0xff]   ;;  %v2389_v12 = vor.u32 %v2388_v50, %v2384_v49  ;;  %v4318_v49 = vor.u32 %v2255_v21, %v2251_v20  ;;  %v2288_v20 = vshll.u32 %v4321_v51, 16 }
  0x88   :  { %v2260_v3 = vshll.u32 %v4269_v40, 16  ;;  %v2258_v2 = vshrl.u32 %v4269_v40, 16 }
  0x89   :  { %1787 = vrot.lane.b32.xlu1 %v4167_v44, %s4030_s23  ;;  %v2382_v44 = vor.u32 %v2381_v36, %v2377_v35  ;;  %v2416_v35 = vrot.slane %v2414_v10, 1  ;;  %v4305_v36 = vld [vmem:[#allocation2 + $0x30] ss:$0 sps:$4 sm:$0xff]   ;;  %v2276_v10 = vrot.slane %v2274_v42, 1 }
  0x8a   :  { %v2262_v6 = vrot.slane %v2260_v3, 1  ;;  %v2421_v50 = vshll.u32 %v4305_v36, 16  ;;  %v2281_v3 = vshll.u32 %v4307_v38, 16  ;;  %v2419_v14 = vshrl.u32 %v4305_v36, 16 }
  0x8b   :  { %2328 = vrot.lane.b32.xlu0 %v4235_v29, %s4025_s1  ;;  %v4333_v63 = vor.u32 %v2416_v35, %v2412_v33 }
  0x8c   :  { %v4331_v62 = vor.u32 %v2262_v6, %v2258_v2  ;;  %v2279_v6 = vshrl.u32 %v4307_v38, 16  ;;  %v2283_v33 = vrot.slane %v2281_v3, 1 }
  0x8d   :  { %1857 = vrot.lane.b32.xlu1 %v4183_v54, %s4031_s24  ;;  %v629_v54 = vunpack.c.0.s8 %v628_v41  ;;  %v2269_v41 = vrot.slane %v2267_v17, 1  ;;  %v2423_v17 = vrot.slane %v2421_v50, 1  ;;  %v2290_v50 = vrot.slane %v2288_v20, 1 }
  0x8f   :  { %2176 = vrot.lane.b32.xlu0 %v4239_v30, %s4028_s21  ;;  %v4302_v27 = vsub.s32 %v629_v54, %v631_v55  ;;  %v4325_v55 = vor.u32 %v2402_v1, %v2398_v23  ;;  %v4339_v8 = vor.u32 %v2269_v41, %v2265_v39  ;;  %v2430_v1 = vrot.slane %v2428_v57, 1 }
  0x90   :  { %v4363_v42 = vor.u32 %v2423_v17, %v2419_v14 }
  0x91   :  { %v357_v59 = vpop.permute.xlu0 %356  ;;  %2454 = vrot.lane.b32.xlu1 %v2382_v44, %s4029_s22 }
  0x93   :  { %2330 = vrot.lane.b32.xlu0 %v4245_v32, %s4025_s1 }
  0x95   :  { %v359_v0 = vpop.permute.xlu0 %358  ;;  %2302 = vrot.lane.b32.xlu1 %v2235_v60, %s4024_s0 }
  0x97   :  { %v501_v28 = vpop.permute.xlu1 %500  ;;  %2178 = vrot.lane.b32.xlu0 %v4251_v37, %s4028_s21 }
  0x98   :  { %v537_v44 = vsel %vm528_vm3, %v357_v59, %v501_v28 }
  0x99   :  { %v580_v52 = vsel %vm577_vm4, %v537_v44, %v357_v59  ;;  %v361_v54 = vpop.permute.xlu0 %360  ;;  %2456 = vrot.lane.b32.xlu1 %v2389_v12, %s4029_s22  ;;  %v4342_v12 = vld [vmem:[#allocation2 + $0x38] ss:$0 sps:$4 sm:$0xff]   ;;  %v2286_v44 = vshrl.u32 %v4321_v51, 16 }
  0x9a   :  { %v597_v60 = vsel %vm594_vm5, %v580_v52, %v501_v28 }
  0x9b   :  { %v681_v4 = vrot.slane %v597_v60, %v4302_v27  ;;  %v503_v59 = vpop.permute.xlu1 %502  ;;  %1789 = vrot.lane.b32.xlu0 %v4192_v58, %s4030_s23  ;;  %v2426_v58 = vshrl.u32 %v4300_v26, 16 }
  0x9c   :  { %v540_v13 = vsel %vm528_vm3, %v359_v0, %v503_v59 }
  0x9d   :  { %v682_v21 = vcombine.high %v681_v4, %v681_v4  ;;  %v581_v23 = vsel %vm577_vm4, %v540_v13, %v359_v0  ;;  %v363_v24 = vpop.permute.xlu0 %362  ;;  %2304 = vrot.lane.b32.xlu1 %v2242_v31, %s4024_s0  ;;  %v4351_v25 = vrot.slane %v681_v4, %v4302_v27  ;;  %v4359_v0 = vor.u32 %v2276_v10, %v2272_v9 }
  0x9e   :  { %v598_v2 = vsel %vm594_vm5, %v581_v23, %v503_v59  ;;  %v2435_v31 = vshll.u32 %v4342_v12, 16  ;;  %v4374_v9 = vor.u32 %v2283_v33, %v2279_v6 }
  0x9f   :  { %v696_v35 = vrot.slane %v682_v21, %v4302_v27  ;;  %v705_v28 = vrot.slane %v598_v2, %v4302_v27  ;;  %v505_v39 = vpop.permute.xlu1 %504  ;;  %1859 = vrot.lane.b32.xlu0 %v4209_v11, %s4031_s24  ;;  %v4369_v11 = vor.u32 %v2430_v1, %v2426_v58  ;;  %v697_v4 = vcombine.high %v4351_v25, %v4351_v25  ;;  %v4386_v1 = vld [vmem:[#allocation2 + $0x3c] ss:$0 sps:$4 sm:$0xff]  }
  0xa0   :  { %v543_v41 = vsel %vm528_vm3, %v361_v54, %v505_v39 }
  0xa1   :  { %v698_v52 = vcombine.high %v696_v35, %v696_v35  ;;  %v706_v57 = vcombine.high %v705_v28, %v705_v28  ;;  %v713_v60 = vrot.slane %v705_v28, %v4302_v27  ;;  %v365_v3 = vpop.permute.xlu0 %364  ;;  %1791 = vrot.lane.b32.xlu1 %v4197_v61, %s4030_s23  ;;  %v582_v59 = vsel %vm577_vm4, %v543_v41, %v361_v54 }
  0xa2   :  { %v4380_v61 = vrot.slane %v2435_v31, 1  ;;  %v599_v23 = vsel %vm594_vm5, %v582_v59, %v505_v39  ;;  %v4384_v54 = vor.u32 %v2290_v50, %v2286_v44 }
  0xa3   :  { %v720_v13 = vrot.slane %v706_v57, %v4302_v27  ;;  %v721_v14 = vcombine.high %v713_v60, %v713_v60  ;;  %v1033_v17 = vunpack.i.h.s16 %v713_v60  ;;  %v507_v20 = vpop.permute.xlu1 %506  ;;  %2332 = vrot.lane.b32.xlu0 %v4256_v15, %s4025_s1  ;;  %v3622_v21 = vpack.i.b16 %v713_v60, %v698_v52 }
  0xa4   :  { %v546_v58 = vsel %vm528_vm3, %v363_v24, %v507_v20  ;;  %v1228_v57 = vcombine.low %v696_v35, %v697_v4  ;;  %v729_v31 = vrot.slane %v599_v23, %v4302_v27 }
  0xa5   :  { %v722_v2 = vcombine.high %v720_v13, %v720_v13  ;;  %v1035_v6 = vunpack.i.h.s16 %v720_v13  ;;  %v1037_v33 = vunpack.i.h.s16 %v721_v14  ;;  %v3623_v28 = vpack.i.b16 %v720_v13, %v1033_v17  ;;  %v367_v41 = vpop.permute.xlu0 %366  ;;  %1861 = vrot.lane.b32.xlu1 %v4213_v16, %s4031_s24 }
  0xa6   :  { %v583_v52 = vsel %vm577_vm4, %v546_v58, %v363_v24  ;;  %v730_v13 = vcombine.high %v729_v31, %v729_v31  ;;  %v737_v17 = vrot.slane %v729_v31, %v4302_v27 }
  0xa7   :  { %v3624_v60 = vpack.i.b16 %v721_v14, %v1035_v6  ;;  %v3625_v44 = vpack.i.b16 %v722_v2, %v1037_v33  ;;  %v1229_v50 = vcombine.low %v3622_v21, %v3623_v28  ;;  %v600_v59 = vsel %vm594_vm5, %v583_v52, %v507_v20  ;;  %v509_v10 = vpop.permute.xlu1 %508  ;;  %2180 = vrot.lane.b32.xlu0 %v4258_v18, %s4028_s21 }
  0xa8   :  { %v753_v16 = vrot.slane %v600_v59, %v4302_v27  ;;  %v549_v35 = vsel %vm528_vm3, %v365_v3, %v509_v10  ;;  %v1238_v21 = vrot.slane %v1228_v57, %v4302_v27  ;;  %v744_v58 = vrot.slane %v730_v13, %v4302_v27 }
  0xa9   :  { %v1230_v4 = vcombine.low %v3624_v60, %v3625_v44  ;;  %v584_v24 = vsel %vm577_vm4, %v549_v35, %v365_v3  ;;  %v511_v23 = vpop.permute.xlu0 %510  ;;  %2458 = vrot.lane.b32.xlu1 %v4311_v34, %s4029_s22  ;;  %v1245_v14 = vrot.slane %v1229_v50, %v4302_v27  ;;  %v745_v33 = vcombine.high %v737_v17, %v737_v17 }
  0xaa   :  { %v754_v2 = vcombine.high %v753_v16, %v753_v16  ;;  %v761_v6 = vrot.slane %v753_v16, %v4302_v27  ;;  %v601_v28 = vsel %vm594_vm5, %v584_v24, %v509_v10  ;;  %v552_v3 = vsel %vm528_vm3, %v367_v41, %v511_v23 }
  0xab   :  { %v369_v31 = vpop.permute.xlu1 %368  ;;  %2306 = vrot.lane.b32.xlu0 %v4316_v46, %s4024_s0  ;;  %v1252_v34 = vrot.slane %v1230_v4, %v4302_v27  ;;  %v746_v52 = vcombine.high %v744_v58, %v744_v58  ;;  %v1231_v60 = vcombine.low %v737_v17, %v744_v58  ;;  %v777_v59 = vrot.slane %v601_v28, %v4302_v27 }
  0xac   :  { %v768_v57 = vrot.slane %v754_v2, %v4302_v27  ;;  %v769_v44 = vcombine.high %v761_v6, %v761_v6  ;;  %v1047_v50 = vunpack.i.h.s16 %v761_v6  ;;  %v585_v13 = vsel %vm577_vm4, %v552_v3, %v367_v41 }
  0xad   :  { %v371_v16 = vpop.permute.xlu0 %370  ;;  %2182 = vrot.lane.b32.xlu1 %v4261_v43, %s4028_s21  ;;  %v1260_v10 = vcombine.low %v1238_v21, %v1245_v14  ;;  %v1259_v35 = vrot.slane %v1231_v60, %v4302_v27  ;;  %v3626_v24 = vpack.i.b16 %v761_v6, %v746_v52  ;;  %v778_v58 = vcombine.high %v777_v59, %v777_v59 }
  0xae   :  { %v1049_v46 = vunpack.i.h.s16 %v768_v57  ;;  %v770_v4 = vcombine.high %v768_v57, %v768_v57  ;;  %v4418_v39 = vpack.i.b16 %v768_v57, %v1047_v50  ;;  %v1051_v17 = vunpack.i.h.s16 %v769_v44 }
  0xaf   :  { %v785_v2 = vrot.slane %v777_v59, %v4302_v27  ;;  %v513_v20 = vpop.permute.xlu1 %512  ;;  %2334 = vrot.lane.b32.xlu0 %v4265_v45, %s4025_s1  ;;  %v4423_v28 = vcombine.low %v745_v33, %v3626_v24  ;;  %v602_v43 = vsel %vm594_vm5, %v585_v13, %v511_v23  ;;  %v792_v6 = vrot.slane %v778_v58, %v4302_v27 }
  0xb0   :  { %v3628_v41 = vpack.i.b16 %v769_v44, %v1049_v46  ;;  %v555_v14 = vsel %vm528_vm3, %v369_v31, %v513_v20  ;;  %v3629_v21 = vpack.i.b16 %v770_v4, %v1051_v17  ;;  %v801_v52 = vrot.slane %v602_v43, %v4302_v27 }
  0xb1   :  { %v793_v3 = vcombine.high %v785_v2, %v785_v2  ;;  %v373_v60 = vpop.permute.xlu0 %372  ;;  %2308 = vrot.lane.b32.xlu1 %v4318_v49, %s4024_s0  ;;  %v586_v44 = vsel %vm577_vm4, %v555_v14, %v369_v31  ;;  %v1261_v33 = vcombine.low %v1252_v34, %v1259_v35  ;;  %v1268_v50 = vrot.slane %v1260_v10, %v4302_v27 }
  0xb2   :  { %v1278_v57 = vcombine.low %v4418_v39, %v3628_v41  ;;  %v794_v23 = vcombine.high %v792_v6, %v792_v6  ;;  %v1279_v59 = vcombine.low %v3629_v21, %v785_v2  ;;  %v802_v13 = vcombine.high %v801_v52, %v801_v52 }
  0xb3   :  { %v515_v46 = vpop.permute.xlu1 %514  ;;  %2460 = vrot.lane.b32.xlu0 %v4325_v55, %s4029_s22  ;;  %v1287_v24 = vrot.slane %v4423_v28, %v4302_v27  ;;  %v1280_v4 = vcombine.low %v792_v6, %v793_v3  ;;  %v809_v49 = vrot.slane %v801_v52, %v4302_v27  ;;  %v603_v39 = vsel %vm594_vm5, %v586_v44, %v513_v20 }
  0xb4   :  { %v1275_v31 = vrot.slane %v1261_v33, %v4302_v27  ;;  %v1301_v34 = vrot.slane %v1279_v59, %v4302_v27  ;;  %v816_v10 = vrot.slane %v802_v13, %v4302_v27  ;;  %v825_v35 = vrot.slane %v603_v39, %v4302_v27 }
  0xb5   :  { %v558_v17 = vsel %vm528_vm3, %v371_v16, %v515_v46  ;;  %v4445_v58 = vpop.permute.xlu0 %374  ;;  %2336 = vrot.lane.b32.xlu1 %v4267_v47, %s4025_s1  ;;  %v817_v55 = vcombine.high %v809_v49, %v809_v49  ;;  %v1061_v2 = vunpack.i.h.s16 %v809_v49  ;;  %v4449_v41 = vpack.i.b16 %v809_v49, %v794_v23 }
  0xb6   :  { %v1276_v20 = vcombine.low %v1268_v50, %v1275_v31  ;;  %v818_v28 = vcombine.high %v816_v10, %v816_v10  ;;  %v1063_v43 = vunpack.i.h.s16 %v816_v10  ;;  %v826_v14 = vcombine.high %v825_v35, %v825_v35 }
  0xb7   :  { %v833_v21 = vrot.slane %v825_v35, %v4302_v27  ;;  %v517_v6 = vpop.permute.xlu1 %516  ;;  %2184 = vrot.lane.b32.xlu0 %v4269_v40, %s4028_s21  ;;  %v1065_v3 = vunpack.i.h.s16 %v817_v55  ;;  %v3631_v52 = vpack.i.b16 %v816_v10, %v1061_v2  ;;  %v587_v47 = vsel %vm577_vm4, %v558_v17, %v371_v16 }
  0xb8   :  { %3792 = vmatmul.mubr.msk.bf16.vlgmr.msra.gmra.mxu1 %vm117_vm2, %v1276_v20  ;;  %v561_v44 = vsel %vm528_vm3, %v373_v60, %v517_v6  ;;  %v1308_v33 = vrot.slane %v1280_v4, %v4302_v27  ;;  %v4458_v50 = vpack.i.b16 %v817_v55, %v1063_v43  ;;  %v840_v23 = vrot.slane %v826_v14, %v4302_v27 }
  0xb9   :  { %v604_v59 = vsel %vm594_vm5, %v587_v47, %v515_v46  ;;  %v377_v13 = vpop.permute.xlu0 %376  ;;  %2462 = vrot.lane.b32.xlu1 %v4327_v56, %s4029_s22  ;;  %v4464_v40 = vpack.i.b16 %v818_v28, %v1065_v3  ;;  %v841_v49 = vcombine.high %v833_v21, %v833_v21  ;;  %v588_v16 = vsel %vm577_vm4, %v561_v44, %v373_v60 }
  0xba   :  { %v849_v39 = vrot.slane %v604_v59, %v4302_v27  ;;  %3795 = vmatprep.mubr.msk.bf16.mxu1 %vm4027_vm1, %v4026_v5  ;;  %v1326_v4 = vcombine.low %v4449_v41, %v3631_v52  ;;  %v842_v31 = vcombine.high %v840_v23, %v840_v23  ;;  %v605_v10 = vsel %vm594_vm5, %v588_v16, %v517_v6 }
  0xbb   :  { %v1294_v46 = vrot.slane %v1278_v57, %v4302_v27  ;;  %v519_v35 = vpop.permute.xlu1 %518  ;;  %1793 = vrot.lane.b32.xlu0 %v4220_v22, %s4030_s23  ;;  %v1328_v56 = vcombine.low %v833_v21, %v840_v23  ;;  %v873_v60 = vrot.slane %v605_v10, %v4302_v27  ;;  %3846 = vmatpush3.bf16.msra.mxu1 %v4121_v7 }
  0xbc   :  { %v850_v17 = vcombine.high %v849_v39, %v849_v39  ;;  %v857_v55 = vrot.slane %v849_v39, %v4302_v27  ;;  %v1327_v2 = vcombine.low %v4458_v50, %v4464_v40  ;;  %v1310_v20 = vcombine.low %v1301_v34, %v1308_v33 }
  0xbd   :  { %v1309_v41 = vcombine.low %v1287_v24, %v1294_v46  ;;  %v564_v57 = vsel %vm528_vm3, %v4445_v58, %v519_v35  ;;  %v521_v28 = vpop.permute.xlu0 %520  ;;  %2310 = vrot.lane.b32.xlu1 %v4331_v62, %s4024_s0  ;;  %v874_v6 = vcombine.high %v873_v60, %v873_v60  ;;  %v881_v3 = vrot.slane %v873_v60, %v4302_v27 }
  0xbe   :  { %v864_v22 = vrot.slane %v850_v17, %v4302_v27  ;;  %v865_v43 = vcombine.high %v857_v55, %v857_v55  ;;  %v1075_v14 = vunpack.i.h.s16 %v857_v55  ;;  %v3634_v21 = vpack.i.b16 %v857_v55, %v842_v31 }
  0xbf   :  { %v1317_v52 = vrot.slane %v1309_v41, %v4302_v27  ;;  %v1324_v24 = vrot.slane %v1310_v20, %v4302_v27  ;;  %v379_v34 = vpop.permute.xlu1 %378  ;;  %1863 = vrot.lane.b32.xlu0 %v4235_v29, %s4031_s24  ;;  %v4491_v47 = vrot.slane %v1328_v56, %v4302_v27  ;;  %v888_v59 = vrot.slane %v874_v6, %v4302_v27 }
  0xc0   :  { %v1077_v62 = vunpack.i.h.s16 %v864_v22  ;;  %v4493_v44 = vpack.i.b16 %v864_v22, %v1075_v14  ;;  %v866_v33 = vcombine.high %v864_v22, %v864_v22  ;;  %v1079_v23 = vunpack.i.h.s16 %v865_v43 }
  0xc1   :  { %v889_v39 = vcombine.high %v881_v3, %v881_v3  ;;  %v1325_v16 = vcombine.low %v1317_v52, %v1324_v24  ;;  %1795 = vrot.lane.b32.xlu1 %v4239_v30, %s4030_s23  ;;  %v353_v31 = vpop.permute.xlu0 %352  ;;  %v4500_v46 = vcombine.low %v841_v49, %v3634_v21  ;;  %v589_v29 = vsel %vm577_vm4, %v564_v57, %v4445_v58 }
  0xc2   :  { %v4498_v10 = vpack.i.b16 %v865_v43, %v1077_v62  ;;  %v567_v56 = vsel %vm528_vm3, %v377_v13, %v521_v28  ;;  %v3637_v17 = vpack.i.b16 %v866_v33, %v1079_v23  ;;  %v606_v60 = vsel %vm594_vm5, %v589_v29, %v519_v35 }
  0xc3   :  { %v4505_v55 = vcombine.low %v888_v59, %v889_v39  ;;  %3796 = vmatmul.mubr.msk.bf16.gmra.mxu1 %vm117_vm2, %v1325_v16  ;;  %v523_v41 = vpop.permute.xlu1 %522  ;;  %v4510_v30 = vrot.slane %v1326_v4, %v4302_v27  ;;  %v890_v20 = vcombine.high %v888_v59, %v888_v59  ;;  %v897_v49 = vrot.slane %v606_v60, %v4302_v27 }
  0xc4   :  { %v590_v22 = vsel %vm577_vm4, %v567_v56, %v377_v13  ;;  %v570_v58 = vsel %vm528_vm3, %v379_v34, %v523_v41  ;;  %2338 = vrot.lane.b32.xlu0 %v4272_v48, %s4025_s1  ;;  %v1375_v57 = vcombine.low %v4493_v44, %v4498_v10  ;;  %v1376_v43 = vcombine.low %v3637_v17, %v881_v3 }
  0xc5   :  { %v607_v35 = vsel %vm594_vm5, %v590_v22, %v521_v28  ;;  %v591_v14 = vsel %vm577_vm4, %v570_v58, %v379_v34  ;;  %1865 = vrot.lane.b32.xlu1 %v4245_v32, %s4031_s24  ;;  %v497_v4 = vpop.permute.xlu0 %496  ;;  %v898_v21 = vcombine.high %v897_v49, %v897_v49  ;;  %v905_v13 = vrot.slane %v897_v49, %v4302_v27 }
  0xc6   :  { %v921_v6 = vrot.slane %v607_v35, %v4302_v27  ;;  %v608_v52 = vsel %vm594_vm5, %v591_v14, %v523_v41  ;;  %3799 = vmatprep.mubr.msk.bf16.mxu1 %vm4027_vm1, %v4026_v5  ;;  %v4529_v48 = vrot.slane %v1376_v43, %v4302_v27  ;;  %v1399_v28 = vrot.slane %v4505_v55, %v4302_v27 }
  0xc7   :  { %v945_v3 = vrot.slane %v608_v52, %v4302_v27  ;;  %v531_v32 = vsel %vm528_vm3, %v353_v31, %v497_v4  ;;  %v355_v24 = vpop.permute.xlu1 %354  ;;  %v912_v34 = vrot.slane %v898_v21, %v4302_v27  ;;  %v913_v62 = vcombine.high %v905_v13, %v905_v13 }
  0xc8   :  { %v1089_v33 = vunpack.i.h.s16 %v905_v13  ;;  %v3638_v23 = vpack.i.b16 %v905_v13, %v890_v20  ;;  %2186 = vrot.lane.b32.xlu0 %v4279_v53, %s4028_s21  ;;  %v922_v59 = vcombine.high %v921_v6, %v921_v6  ;;  %v929_v39 = vrot.slane %v921_v6, %v4302_v27 }
  0xc9   :  { %v946_v16 = vcombine.high %v945_v3, %v945_v3  ;;  %v953_v29 = vrot.slane %v945_v3, %v4302_v27  ;;  %2464 = vrot.lane.b32.xlu1 %v4333_v63, %s4029_s22  ;;  %v4542_v56 = vpop.permute.xlu0 %380  ;;  %v914_v17 = vcombine.high %v912_v34, %v912_v34  ;;  %v1091_v60 = vunpack.i.h.s16 %v912_v34 }
  0xca   :  { %v1093_v41 = vunpack.i.h.s16 %v913_v62  ;;  %v3639_v49 = vpack.i.b16 %v912_v34, %v1089_v33  ;;  %v936_v20 = vrot.slane %v922_v59, %v4302_v27  ;;  %v1343_v58 = vrot.slane %v1327_v2, %v4302_v27 }
  0xcb   :  { %v960_v22 = vrot.slane %v946_v16, %v4302_v27  ;;  %v961_v53 = vcombine.high %v953_v29, %v953_v29  ;;  %v499_v43 = vpop.permute.xlu1 %498  ;;  %v3640_v35 = vpack.i.b16 %v913_v62, %v1091_v60  ;;  %v1103_v21 = vunpack.i.h.s16 %v953_v29 }
  0xcc   :  { %v3641_v14 = vpack.i.b16 %v914_v17, %v1093_v41  ;;  %v1378_v63 = vcombine.low %v3638_v23, %v3639_v49  ;;  %2340 = vrot.lane.b32.xlu0 %v4305_v36, %s4025_s1  ;;  %v938_v13 = vcombine.high %v936_v20, %v936_v20  ;;  %v1425_v6 = vcombine.low %v929_v39, %v936_v20 }
  0xcd   :  { %v1105_v52 = vunpack.i.h.s16 %v960_v22  ;;  %v578_v3 = vsel %vm577_vm4, %v531_v32, %v353_v31  ;;  %2312 = vrot.lane.b32.xlu1 %v4339_v8, %s4024_s0  ;;  %v525_v34 = vpop.permute.xlu0 %524  ;;  %v937_v50 = vcombine.high %v929_v39, %v929_v39  ;;  %v4555_v40 = vpack.i.b16 %v960_v22, %v1103_v21 }
  0xce   :  { %v1424_v33 = vcombine.low %v3640_v35, %v3641_v14  ;;  %v595_v2 = vsel %vm594_vm5, %v578_v3, %v497_v4  ;;  %v4559_v62 = vrot.slane %v1425_v6, %v4302_v27  ;;  %v3642_v23 = vpack.i.b16 %v953_v29, %v938_v13 }
  0xcf   :  { %v4561_v59 = vpack.i.b16 %v961_v53, %v1105_v52  ;;  %v633_v16 = vrot.slane %v595_v2, %v4302_v27  ;;  %v383_v17 = vpop.permute.xlu1 %382  ;;  %v1357_v8 = vrot.slane %v4500_v46, %v4302_v27  ;;  %v1358_v32 = vcombine.low %v4510_v30, %v1343_v58 }
  0xd0   :  { %v4565_v31 = vrot.slane %v1424_v33, %v4302_v27  ;;  %v534_v39 = vsel %vm528_vm3, %v355_v24, %v499_v43  ;;  %2314 = vrot.lane.b32.xlu0 %v4359_v0, %s4024_s0  ;;  %v1406_v4 = vrot.slane %v1378_v63, %v4302_v27  ;;  %v4574_v29 = vcombine.low %v937_v50, %v3642_v23 }
  0xd1   :  { %v634_v60 = vcombine.high %v633_v16, %v633_v16  ;;  %v641_v41 = vrot.slane %v633_v16, %v4302_v27  ;;  %2188 = vrot.lane.b32.xlu1 %v4293_v19, %s4028_s21  ;;  %v4579_v49 = vpop.permute.xlu0 %2166  ;;  %v1427_v30 = vcombine.low %v4555_v40, %v4561_v59  ;;  %v1359_v0 = vcombine.low %v4491_v47, %v1357_v8 }
  0xd2   :  { %v1456_v46 = vcombine.low %v4565_v31, %v4559_v62  ;;  %v579_v20 = vsel %vm577_vm4, %v534_v39, %v355_v24  ;;  %v1448_v58 = vrot.slane %v4574_v29, %v4302_v27  ;;  %v1366_v14 = vrot.slane %v1358_v32, %v4302_v27 }
  0xd3   :  { %v648_v35 = vrot.slane %v634_v60, %v4302_v27  ;;  %v596_v19 = vsel %vm594_vm5, %v579_v20, %v499_v43  ;;  %v527_v63 = vpop.permute.xlu1 %526  ;;  %v1373_v21 = vrot.slane %v1359_v0, %v4302_v27  ;;  %v962_v6 = vcombine.high %v960_v22, %v960_v22 }
  0xd4   :  { %v657_v13 = vrot.slane %v596_v19, %v4302_v27  ;;  %v1107_v52 = vunpack.i.h.s16 %v961_v53  ;;  %2342 = vrot.lane.b32.xlu0 %v4300_v26, %s4025_s1  ;;  %v573_v3 = vsel %vm528_vm3, %v4542_v56, %v525_v34  ;;  %v1385_v43 = vrot.slane %v1375_v57, %v4302_v27 }
  0xd5   :  { %v650_v47 = vcombine.high %v648_v35, %v648_v35  ;;  %v1179_v24 = vcombine.low %v641_v41, %v648_v35  ;;  %2466 = vrot.lane.b32.xlu1 %v4363_v42, %s4029_s22  ;;  %v2293_v33 = vpop.permute.xlu0 %2292  ;;  %v649_v50 = vcombine.high %v641_v41, %v641_v41  ;;  %v1374_v22 = vcombine.low %v1366_v14, %v1373_v21 }
  0xd6   :  { %v658_v53 = vcombine.high %v657_v13, %v657_v13  ;;  %v665_v2 = vrot.slane %v657_v13, %v4302_v27  ;;  %v4605_v26 = vpack.i.b16 %v962_v6, %v1107_v52  ;;  %v592_v23 = vsel %vm577_vm4, %v573_v3, %v4542_v56 }
  0xd7   :  { %v1407_v16 = vcombine.low %v1385_v43, %v4529_v48  ;;  %v1408_v44 = vcombine.low %v1399_v28, %v1406_v4  ;;  %v4613_v10 = vpop.permute.xlu1 %2168  ;;  %3800 = vmatmul.mubr.msk.bf16.gmra.mxu1 %vm117_vm2, %v1374_v22  ;;  %v1189_v56 = vrot.slane %v1179_v24, %v4302_v27  ;;  %v609_v48 = vsel %vm594_vm5, %v592_v23, %v525_v34 }
  0xd8   :  { %v672_v42 = vrot.slane %v658_v53, %v4302_v27  ;;  %v673_v57 = vcombine.high %v665_v2, %v665_v2  ;;  %v1019_v8 = vunpack.i.h.s16 %v665_v2  ;;  %v3618_v32 = vpack.i.b16 %v665_v2, %v650_v47  ;;  %1797 = vrot.lane.b32.xlu0 %v4251_v37, %s4030_s23  ;;  %3803 = vmatprep.mubr.msk.bf16.mxu1 %vm4027_vm1, %v4026_v5 }
  0xd9   :  { %v1422_v55 = vrot.slane %v1408_v44, %v4302_v27  ;;  %v576_v28 = vsel %vm528_vm3, %v383_v17, %v527_v63  ;;  %v2321_v39 = vpop.permute.xlu0 %2320  ;;  %v1415_v0 = vrot.slane %v1407_v16, %v4302_v27  ;;  %2468 = vrot.lane.b32.xlu1 %v4369_v11, %s4029_s22  ;;  %v969_v34 = vrot.slane %v609_v48, %v4302_v27 }
  0xda   :  { %v674_v4 = vcombine.high %v672_v42, %v672_v42  ;;  %v1021_v60 = vunpack.i.h.s16 %v672_v42  ;;  %v1023_v41 = vunpack.i.h.s16 %v673_v57  ;;  %v3619_v37 = vpack.i.b16 %v672_v42, %v1019_v8 }
  0xdb   :  { %v1180_v20 = vcombine.low %v649_v50, %v3618_v32  ;;  %v593_v35 = vsel %vm577_vm4, %v576_v28, %v383_v17  ;;  %v2295_v14 = vpop.permute.xlu1 %2294  ;;  %v1423_v13 = vcombine.low %v1415_v0, %v1422_v55  ;;  %v970_v47 = vcombine.high %v969_v34, %v969_v34 }
  0xdc   :  { %v3620_v19 = vpack.i.b16 %v673_v57, %v1021_v60  ;;  %v3621_v21 = vpack.i.b16 %v674_v4, %v1023_v41  ;;  %v610_v6 = vsel %vm594_vm5, %v593_v35, %v527_v63  ;;  %1867 = vrot.lane.b32.xlu0 %v4256_v15, %s4031_s24  ;;  %v977_v11 = vrot.slane %v969_v34, %v4302_v27 }
  0xdd   :  { %v1196_v52 = vrot.slane %v1180_v20, %v4302_v27  ;;  %v993_v24 = vrot.slane %v610_v6, %v4302_v27  ;;  %v2447_v3 = vpop.permute.xlu0 %2446  ;;  %v2476_v50 = vsel %vm528_vm3, %v4579_v49, %v2293_v33  ;;  %v1455_v63 = vrot.slane %v1427_v30, %v4302_v27  ;;  %1799 = vrot.lane.b32.xlu1 %v4258_v18, %s4030_s23 }
  0xde   :  { %v1181_v43 = vcombine.low %v3619_v37, %v3620_v19  ;;  %v1182_v17 = vcombine.low %v3621_v21, %v4351_v25  ;;  %v984_v22 = vrot.slane %v970_v47, %v4302_v27  ;;  %v985_v53 = vcombine.high %v977_v11, %v977_v11 }
  0xdf   :  { %v1211_v15 = vcombine.low %v1189_v56, %v1196_v52  ;;  %v1473_v2 = vcombine.low %v4605_v26, %v977_v11  ;;  %v2323_v23 = vpop.permute.xlu1 %2322  ;;  %3804 = vmatmul.mubr.msk.bf16.gmra.mxu1 %vm117_vm2, %v1423_v13  ;;  %v994_v49 = vcombine.high %v993_v24, %v993_v24  ;;  %v1001_v40 = vrot.slane %v993_v24, %v4302_v27 }
  0xe0   :  { %v1203_v25 = vrot.slane %v1181_v43, %v4302_v27  ;;  %v1210_v16 = vrot.slane %v1182_v17, %v4302_v27  ;;  %v986_v30 = vcombine.high %v984_v22, %v984_v22  ;;  %v1474_v18 = vcombine.low %v984_v22, %v985_v53  ;;  %3807 = vmatprep.mubr.msk.bf16.mxu1 %vm4027_vm1, %v4026_v5 }
  0xe1   :  { %v1219_v59 = vrot.slane %v1211_v15, %v4302_v27  ;;  %v2517_v33 = vsel %vm577_vm4, %v2476_v50, %v2321_v39  ;;  %v2171_v26 = vpop.permute.xlu0 %2170  ;;  %v1008_v42 = vrot.slane %v994_v49, %v4302_v27  ;;  %v1009_v57 = vcombine.high %v1001_v40, %v1001_v40  ;;  %2190 = vrot.lane.b32.xlu0 %v4307_v38, %s4028_s21 }
  0xe2   :  { %v1212_v44 = vcombine.low %v1203_v25, %v1210_v16  ;;  %v1117_v8 = vunpack.i.h.s16 %v1001_v40  ;;  %1869 = vrot.lane.b32.xlu1 %v4265_v45, %s4031_s24  ;;  %v1483_v32 = vrot.slane %v1473_v2, %v4302_v27  ;;  %v1490_v56 = vrot.slane %v1474_v18, %v4302_v27 }
  0xe3   :  { %v3646_v48 = vpack.i.b16 %v1001_v40, %v986_v30  ;;  %v1457_v55 = vcombine.low %v1448_v58, %v1455_v63  ;;  %v2449_v28 = vpop.permute.xlu1 %2448  ;;  %v1010_v4 = vcombine.high %v1008_v42, %v1008_v42  ;;  %v1119_v60 = vunpack.i.h.s16 %v1008_v42 }
  0xe4   :  { %v1226_v39 = vrot.slane %v1212_v44, %v4302_v27  ;;  %v1121_v41 = vunpack.i.h.s16 %v1009_v57  ;;  %v3647_v0 = vpack.i.b16 %v1008_v42, %v1117_v8  ;;  %v1464_v45 = vrot.slane %v1456_v46, %v4302_v27 }
  0xe5   :  { %v1471_v38 = vrot.slane %v1457_v55, %v4302_v27  ;;  %v2479_v37 = vsel %vm528_vm3, %v4613_v10, %v2295_v14  ;;  %v2325_v20 = vpop.permute.xlu0 %2324  ;;  %v3648_v29 = vpack.i.b16 %v1009_v57, %v1119_v60  ;;  %v2545_v34 = vsel %vm594_vm5, %v2517_v33, %v2447_v3  ;;  %2316 = vrot.lane.b32.xlu0 %v4374_v9, %s4024_s0 }
  0xe6   :  { %v3649_v58 = vpack.i.b16 %v1010_v4, %v1121_v41  ;;  %v2519_v35 = vsel %vm577_vm4, %v2479_v37, %v2323_v23  ;;  %v1475_v19 = vcombine.low %v3646_v48, %v3647_v0  ;;  %v2592_v62 = vrot.slane %v2545_v34, %v4302_v27  ;;  %2192 = vrot.lane.b32.xlu1 %v4321_v51, %s4028_s21 }
  0xe7   :  { %v1472_v21 = vcombine.low %v1464_v45, %v1471_v38  ;;  %v2547_v31 = vsel %vm594_vm5, %v2519_v35, %v2449_v28  ;;  %v2297_v46 = vpop.permute.xlu1 %2296  ;;  %v1227_v13 = vcombine.low %v1219_v59, %v1226_v39  ;;  %v5069_v6 = vshll.u32 %v4386_v1, 16  ;;  %v3945_v45 = vld [vmem:[#allocation2 + $0x24] ss:$0 sps:$4 sm:$0xff]  }
  0xe8   :  { %v1476_v10 = vcombine.low %v3648_v29, %v3649_v58  ;;  %v2616_v14 = vrot.slane %v2547_v31, %v4302_v27  ;;  %v1505_v47 = vcombine.low %v1483_v32, %v1490_v56  ;;  %v2593_v9 = vcombine.high %v2592_v62, %v2592_v62 }
  0xe9   :  { %v2444_v52 = vrot.slane %v5069_v6, 1  ;;  %3808 = vmatmul.mubr.msk.bf16.gmra.mxu1 %vm117_vm2, %v1472_v21  ;;  %v2600_v11 = vrot.slane %v2592_v62, %v4302_v27  ;;  %v2299_v24 = vpop.permute.xlu0 %2298  ;;  %v5070_v3 = vshrl.u32 %v4342_v12, 16  ;;  %3788 = vmatmul.mubr.msk.bf16.vlgmr.msra.gmra.mxu0 %vm117_vm2, %v1227_v13  ;;  %v1497_v63 = vrot.slane %v1475_v19, %v4302_v27  ;;  %v3946_v62 = vld [vmem:[#allocation2 + $0x28] ss:$0 sps:$4 sm:$0xff]  }
  0xea   :  { %v2617_v51 = vcombine.high %v2616_v14, %v2616_v14  ;;  %v2624_v17 = vrot.slane %v2616_v14, %v4302_v27  ;;  %2344 = vrot.lane.b32.xlu0 %v4342_v12, %s4025_s1  ;;  %v1504_v50 = vrot.slane %v1476_v10, %v4302_v27  ;;  %v2607_v15 = vrot.slane %v2593_v9, %v4302_v27  ;;  %v3947_v14 = vld [vmem:[#allocation2 + $0x28] ss:$0 sps:$4 sm:$0xff]  }
  0xeb   :  { %v2438_v43 = vor.u32 %v4380_v61, %v5070_v3  ;;  %v2482_v22 = vsel %vm528_vm3, %v2171_v26, %v2297_v46  ;;  %2318 = vrot.lane.b32.xlu1 %v4384_v54, %s4024_s0  ;;  %3811 = vmatprep.mubr.msk.bf16.mxu1 %vm4027_vm1, %v4026_v5  ;;  %v2173_v61 = vpop.permute.xlu1 %2172  ;;  %v5071_v23 = vshrl.u32 %v4386_v1, 16  ;;  %v1513_v54 = vrot.slane %v1505_v47, %v4302_v27 }
  0xec   :  { %v2631_v53 = vrot.slane %v2617_v51, %v4302_v27  ;;  %v2632_v2 = vcombine.high %v2624_v17, %v2624_v17  ;;  %3816 = vmatpush3.bf16.msra.mxu0 %v4121_v7  ;;  %3817 = vmatprep.mubr.msk.bf16.mxu0 %vm4027_vm1, %v4026_v5  ;;  %v2609_v16 = vcombine.high %v2607_v15, %v2607_v15  ;;  %v2930_v49 = vunpack.i.h.s16 %v2624_v17  ;;  %v3949_v51 = vld [vmem:[#allocation2 + $0x2c] ss:$0 sps:$4 sm:$0xff]  }
  0xed   :  { %v2445_v25 = vor.u32 %v2444_v52, %v5071_v23  ;;  %v1506_v40 = vcombine.low %v1497_v63, %v1504_v50  ;;  %v2327_v59 = vpop.permute.xlu0 %2326  ;;  %v2608_v30 = vcombine.high %v2600_v11, %v2600_v11  ;;  %v2521_v26 = vsel %vm577_vm4, %v2482_v22, %v2325_v20  ;;  %v3950_v23 = vld [vmem:[#allocation2 + $0x30] ss:$0 sps:$4 sm:$0xff]  }
  0xee   :  { %v2932_v18 = vunpack.i.h.s16 %v2631_v53  ;;  %2470 = vrot.lane.b32.xlu0 %v2438_v43, %s4029_s22  ;;  %v2633_v33 = vcombine.high %v2631_v53, %v2631_v53  ;;  %v3699_v44 = vpack.i.b16 %v2624_v17, %v2609_v16  ;;  %v2485_v42 = vsel %vm528_vm3, %v2173_v61, %v2299_v24  ;;  %v3948_v24 = vld [vmem:[#allocation2 + $0x2c] ss:$0 sps:$4 sm:$0xff]  }
  0xef   :  { %v1520_v7 = vrot.slane %v1506_v40, %v4302_v27  ;;  %2346 = vrot.lane.b32.xlu1 %v4386_v1, %s4025_s1  ;;  %v2934_v57 = vunpack.i.h.s16 %v2632_v2  ;;  %v2451_v8 = vpop.permute.xlu1 %2450  ;;  %v3069_v32 = vcombine.low %v2600_v11, %v2607_v15  ;;  %v3700_v55 = vpack.i.b16 %v2631_v53, %v2930_v49 }
  0xf0   :  { %v3701_v56 = vpack.i.b16 %v2632_v2, %v2932_v18  ;;  %v2549_v48 = vsel %vm594_vm5, %v2521_v26, %v2451_v8  ;;  %v3070_v28 = vcombine.low %v2608_v30, %v3699_v44  ;;  %v2523_v41 = vsel %vm577_vm4, %v2485_v42, %v2327_v59  ;;  %v3951_v42 = vld [vmem:[#allocation2 + $0x34] ss:$0 sps:$4 sm:$0xff]  }
  0xf1   :  { %v1521_v39 = vcombine.low %v1513_v54, %v1520_v7  ;;  %v2640_v4 = vrot.slane %v2549_v48, %v4302_v27  ;;  %v2175_v60 = vpop.permute.xlu0 %2174  ;;  %v3702_v0 = vpack.i.b16 %v2633_v33, %v2934_v57  ;;  %v3079_v34 = vrot.slane %v3069_v32, %v4302_v27  ;;  %v3952_v57 = vld [vmem:[#allocation2 + $0x34] ss:$0 sps:$4 sm:$0xff]  }
  0xf2   :  { %1801 = vrot.lane.b32.xlu0 %v3945_v45, %s4030_s23  ;;  %v3071_v38 = vcombine.low %v3700_v55, %v3701_v56  ;;  %v3086_v37 = vrot.slane %v3070_v28, %v4302_v27 }
  0xf3   :  { %3812 = vmatmul.mubr.msk.bf16.gmra.mxu1 %vm117_vm2, %v1521_v39  ;;  %v4721_v20 = vrot.slane %v2640_v4, %v4302_v27  ;;  %2472 = vrot.lane.b32.xlu1 %v2445_v25, %s4029_s22  ;;  %v2453_v29 = vpop.permute.xlu1 %2452  ;;  %v2641_v6 = vcombine.high %v2640_v4, %v2640_v4 }
  0xf4   :  { %v2551_v58 = vsel %vm594_vm5, %v2523_v41, %v2453_v29  ;;  %3847 = vmatprep.mubr.msk.bf16.mxu1 %vm4027_vm1, %v4026_v5  ;;  %v3101_v31 = vcombine.low %v3079_v34, %v3086_v37  ;;  %v3093_v46 = vrot.slane %v3071_v38, %v4302_v27 }
  0xf5   :  { %v3072_v35 = vcombine.low %v3702_v0, %v4721_v20  ;;  %v1786_v19 = vpop.permute.xlu0 %1785  ;;  %v2664_v21 = vrot.slane %v2551_v58, %v4302_v27  ;;  %v2655_v50 = vrot.slane %v2641_v6, %v4302_v27  ;;  %v2656_v32 = vcombine.high %v4721_v20, %v4721_v20  ;;  %v3953_v0 = vld [vmem:[#allocation2 + $0x38] ss:$0 sps:$4 sm:$0xff]  }
  0xf6   :  { %1871 = vrot.lane.b32.xlu0 %v3946_v62, %s4031_s24  ;;  %v3109_v3 = vrot.slane %v3101_v31, %v4302_v27 }
  0xf7   :  { %v3100_v10 = vrot.slane %v3072_v35, %v4302_v27  ;;  %1803 = vrot.lane.b32.xlu1 %v3947_v14, %s4030_s23  ;;  %v2301_v13 = vpop.permute.xlu1 %2300  ;;  %v2665_v52 = vcombine.high %v2664_v21, %v2664_v21  ;;  %v2672_v9 = vrot.slane %v2664_v21, %v4302_v27  ;;  %v2657_v16 = vcombine.high %v2655_v50, %v2655_v50 }
  0xf8   :  { %v2488_v26 = vsel %vm528_vm3, %v2175_v60, %v2301_v13  ;;  %v3118_v38 = vcombine.low %v2655_v50, %v2656_v32 }
  0xf9   :  { %v3102_v47 = vcombine.low %v3093_v46, %v3100_v10  ;;  %v1856_v11 = vpop.permute.xlu0 %1855  ;;  %v2679_v63 = vrot.slane %v2665_v52, %v4302_v27  ;;  %v2680_v22 = vcombine.high %v2672_v9, %v2672_v9  ;;  %v2944_v53 = vunpack.i.h.s16 %v2672_v9 }
  0xfa   :  { %1805 = vrot.lane.b32.xlu0 %v3948_v24, %s4030_s23  ;;  %v1898_v2 = vsel %vm577_vm4, %v1786_v19, %v1856_v11  ;;  %v3703_v56 = vpack.i.b16 %v2672_v9, %v2657_v16  ;;  %v3128_v62 = vrot.slane %v3118_v38, %v4302_v27 }
  0xfb   :  { %v3116_v43 = vrot.slane %v3102_v47, %v4302_v27  ;;  %1873 = vrot.lane.b32.xlu1 %v3949_v51, %s4031_s24  ;;  %v1788_v17 = vpop.permute.xlu1 %1787  ;;  %v2681_v49 = vcombine.high %v2679_v63, %v2679_v63  ;;  %v2946_v54 = vunpack.i.h.s16 %v2679_v63  ;;  %v2948_v59 = vunpack.i.h.s16 %v2680_v22 }
  0xfc   :  { %v1925_v30 = vsel %vm594_vm5, %v1898_v2, %v1856_v11  ;;  %v3704_v33 = vpack.i.b16 %v2679_v63, %v2944_v53  ;;  %v3771_v11 = vpop.f32.mrf.mxu0 }
  0xfd   :  { %v3117_v15 = vcombine.low %v3109_v3, %v3116_v43  ;;  %v2329_v61 = vpop.permute.xlu0 %2328  ;;  %v3705_v55 = vpack.i.b16 %v2680_v22, %v2946_v54  ;;  %v3706_v28 = vpack.i.b16 %v2681_v49, %v2948_v59 }
  0xfe   :  { %1875 = vrot.lane.b32.xlu0 %v4305_v36, %s4031_s24  ;;  %v2525_v7 = vsel %vm577_vm4, %v2488_v26, %v2329_v61  ;;  %v3119_v60 = vcombine.low %v3703_v56, %v3704_v33  ;;  %v180_v63 = vpop.f32.mrf.mxu0 }
  0xff   :  { %1807 = vrot.lane.b32.xlu1 %v3950_v23, %s4030_s23  ;;  %v1858_v25 = vpop.permute.xlu1 %1857  ;;  %3848 = vmatmul.mubr.msk.bf16.vlgmr.msra.gmra.mxu1 %vm117_vm2, %v3117_v15  ;;  %v3120_v20 = vcombine.low %v3705_v55, %v3706_v28  ;;  %v282_v54 = vmul.f32 %v180_v63, %v180_v63  ;;  %v244_v33 = vsel %vm243_vm6, %v180_v63, 0.0 }
 0x100   :  { %v1900_v40 = vsel %vm577_vm4, %v1788_v17, %v1858_v25  ;;  %3851 = vmatprep.mubr.msk.bf16.mxu1 %vm4027_vm1, %v4026_v5  ;;  %v3135_v35 = vrot.slane %v3119_v60, %v4302_v27  ;;  %v3772_v59 = vpop.f32.mrf.mxu0 }
 0x101   :  { %v1926_v18 = vsel %vm594_vm5, %v1900_v40, %v1858_v25  ;;  %v2177_v36 = vpop.permute.xlu0 %2176  ;;  %v3142_v46 = vrot.slane %v3120_v20, %v4302_v27  ;;  %v284_v40 = vmul.f32 %v3771_v11, %v3771_v11 }
 0x102   :  { %v3685_v44 = vcombine.low %v1925_v30, %v1926_v18  ;;  %1809 = vrot.lane.b32.xlu0 %v3951_v42, %s4030_s23  ;;  %v3150_v6 = vcombine.low %v3128_v62, %v3135_v35  ;;  %v183_v60 = vpop.f32.mrf.mxu0 }
 0x103   :  { %1877 = vrot.lane.b32.xlu1 %v3952_v57, %s4031_s24  ;;  %v2455_v8 = vpop.permute.xlu1 %2454  ;;  %v285_v57 = vmul.f32 %v3772_v59, %v3772_v59  ;;  %v283_v38 = vmul.f32 %v183_v60, %v183_v60 }
 0x104   :  { %v2553_v48 = vsel %vm594_vm5, %v2525_v7, %v2455_v8  ;;  %3818 = vmatmul.mubr.msk.bf16.vlgmr.msra.gmra.mxu0 %vm117_vm2, %v3685_v44  ;;  %v3158_v43 = vrot.slane %v3150_v6, %v4302_v27  ;;  %v3775_v35 = vpop.f32.mrf.mxu0 }
 0x105   :  { %v2688_v39 = vrot.slane %v2553_v48, %v4302_v27  ;;  %v2331_v4 = vpop.permute.xlu0 %2330  ;;  %3821 = vmatprep.mubr.msk.bf16.mxu0 %vm4027_vm1, %v4026_v5  ;;  %v299_v62 = vsel %vm243_vm6, %v283_v38, 0.0 }
 0x106   :  { %1879 = vrot.lane.b32.xlu0 %v4342_v12, %s4031_s24  ;;  %v196_v6 = vpop.f32.mrf.mxu0 }
 0x107   :  { %v2689_v41 = vcombine.high %v2688_v39, %v2688_v39  ;;  %1811 = vrot.lane.b32.xlu1 %v3953_v0, %s4030_s23  ;;  %v2303_v45 = vpop.permute.xlu1 %2302  ;;  %v2696_v29 = vrot.slane %v2688_v39, %v4302_v27  ;;  %v247_v39 = vsel %vm243_vm6, %v3771_v11, 0.0  ;;  %v286_v11 = vmul.f32 %v196_v6, %v196_v6 }
 0x108   :  { %v2491_v37 = vsel %vm528_vm3, %v2177_v36, %v2303_v45  ;;  %v245_v45 = vsel %vm243_vm6, %v183_v60, 0.0 }
 0x109   :  { %v2703_v58 = vrot.slane %v2689_v41, %v4302_v27  ;;  %v2179_v34 = vpop.permute.xlu0 %2178  ;;  %v2527_v21 = vsel %vm577_vm4, %v2491_v37, %v2331_v4  ;;  %v2704_v16 = vcombine.high %v2696_v29, %v2696_v29  ;;  %v298_v4 = vsel %vm243_vm6, %v282_v54, 0.0 }
 0x10b   :  { %v3121_v19 = vcombine.low %v2696_v29, %v2703_v58  ;;  %1881 = vrot.lane.b32.xlu1 %v4386_v1, %s4031_s24  ;;  %v2457_v12 = vpop.permute.xlu1 %2456  ;;  %v2705_v2 = vcombine.high %v2703_v58, %v2703_v58  ;;  %v301_v29 = vsel %vm243_vm6, %v284_v40, 0.0  ;;  %v249_v58 = vsel %vm243_vm6, %v3772_v59, 0.0 }
 0x10c   :  { %v2555_v31 = vsel %vm594_vm5, %v2527_v21, %v2457_v12  ;;  %v303_v21 = vsel %vm243_vm6, %v285_v57, 0.0 }
 0x10d   :  { %v3149_v10 = vrot.slane %v3121_v19, %v4302_v27  ;;  %v2712_v14 = vrot.slane %v2555_v31, %v4302_v27  ;;  %v1790_v13 = vpop.permute.xlu0 %1789 }
 0x10f   :  { %v3151_v52 = vcombine.low %v3142_v46, %v3149_v10  ;;  %v2713_v47 = vcombine.high %v2712_v14, %v2712_v14  ;;  %v2305_v9 = vpop.permute.xlu1 %2304  ;;  %v2720_v1 = vrot.slane %v2712_v14, %v4302_v27 }
 0x110   :  { %v2494_v26 = vsel %vm528_vm3, %v2179_v34, %v2305_v9  ;;  %v246_v34 = vadd.f32 %v245_v45, %v244_v33  ;;  %v251_v9 = vsel %vm243_vm6, %v196_v6, 0.0 }
 0x111   :  { %v2727_v24 = vrot.slane %v2713_v47, %v4302_v27  ;;  %v1860_v3 = vpop.permute.xlu0 %1859  ;;  %v3165_v51 = vrot.slane %v3151_v52, %v4302_v27  ;;  %v2728_v15 = vcombine.high %v2720_v1, %v2720_v1  ;;  %v2958_v22 = vunpack.i.h.s16 %v2720_v1 }
 0x112   :  { %v1902_v25 = vsel %vm577_vm4, %v1790_v13, %v1860_v3  ;;  %v3707_v30 = vpack.i.b16 %v2720_v1, %v2705_v2  ;;  %v248_v14 = vadd.f32 %v247_v39, %v246_v34  ;;  %v300_v13 = vadd.f32 %v299_v62, %v298_v4 }
 0x113   :  { %v2960_v17 = vunpack.i.h.s16 %v2727_v24  ;;  %v1792_v50 = vpop.permute.xlu1 %1791  ;;  %v3166_v61 = vcombine.low %v3158_v43, %v3165_v51  ;;  %v3708_v18 = vpack.i.b16 %v2727_v24, %v2958_v22  ;;  %v1927_v44 = vsel %vm594_vm5, %v1902_v25, %v1860_v3 }
 0x114   :  { %v2729_v56 = vcombine.high %v2727_v24, %v2727_v24  ;;  %v2962_v48 = vunpack.i.h.s16 %v2728_v15  ;;  %v3167_v41 = vcombine.low %v2704_v16, %v3707_v30  ;;  %v302_v51 = vadd.f32 %v301_v29, %v300_v13 }
 0x115   :  { %v2333_v53 = vpop.permute.xlu0 %2332  ;;  %v3709_v23 = vpack.i.b16 %v2728_v15, %v2960_v17  ;;  %3852 = vmatmul.mubr.msk.bf16.gmra.mxu1 %vm117_vm2, %v3166_v61  ;;  %v3776_v17 = vpop.f32.mrf.mxu0  ;;  %v250_v63 = vadd.f32 %v249_v58, %v248_v14  ;;  %v305_v15 = vsel %vm243_vm6, %v286_v11, 0.0  ;;  %v255_v2 = vsel %vm243_vm6, %v3775_v35, 0.0 }
 0x116   :  { %3855 = vmatprep.mubr.msk.bf16.mxu1 %vm4027_vm1, %v4026_v5  ;;  %v2529_v55 = vsel %vm577_vm4, %v2494_v26, %v2333_v53  ;;  %v3710_v19 = vpack.i.b16 %v2729_v56, %v2962_v48  ;;  %v3177_v52 = vrot.slane %v3167_v41, %v4302_v27  ;;  %v257_v56 = vsel %vm243_vm6, %v3776_v17, 0.0 }
 0x117   :  { %v1862_v49 = vpop.permute.xlu1 %1861  ;;  %v3168_v8 = vcombine.low %v3708_v18, %v3709_v23  ;;  %v304_v23 = vadd.f32 %v303_v21, %v302_v51  ;;  %v199_v25 = vpop.f32.mrf.mxu0  ;;  %v252_v40 = vadd.f32 %v251_v9, %v250_v63 }
 0x118   :  { %v1904_v36 = vsel %vm577_vm4, %v1792_v50, %v1862_v49  ;;  %v288_v50 = vmul.f32 %v3775_v35, %v3775_v35  ;;  %v253_v54 = vsel %vm243_vm6, %v199_v25, 0.0  ;;  %v287_v33 = vmul.f32 %v199_v25, %v199_v25 }
 0x119   :  { %v1928_v42 = vsel %vm594_vm5, %v1904_v36, %v1862_v49  ;;  %v2181_v7 = vpop.permute.xlu0 %2180  ;;  %v3184_v12 = vrot.slane %v3168_v8, %v4302_v27  ;;  %v306_v18 = vadd.f32 %v305_v15, %v304_v23  ;;  %v289_v36 = vmul.f32 %v3776_v17, %v3776_v17  ;;  %v3779_v26 = vpop.f32.mrf.mxu0 }
 0x11a   :  { %v3686_v32 = vcombine.low %v1927_v44, %v1928_v42  ;;  %v309_v42 = vsel %vm243_vm6, %v288_v50, 0.0  ;;  %v307_v48 = vsel %vm243_vm6, %v287_v33, 0.0  ;;  %v263_v50 = vsel %vm243_vm6, %v3779_v26, 0.0 }
 0x11b   :  { %v2459_v28 = vpop.permute.xlu1 %2458  ;;  %v3199_v53 = vcombine.low %v3177_v52, %v3184_v12  ;;  %v308_v4 = vadd.f32 %v307_v48, %v306_v18  ;;  %v311_v45 = vsel %vm243_vm6, %v289_v36, 0.0 }
 0x11c   :  { %v2557_v0 = vsel %vm594_vm5, %v2529_v55, %v2459_v28  ;;  %3822 = vmatmul.mubr.msk.bf16.gmra.mxu0 %vm117_vm2, %v3686_v32  ;;  %v212_v55 = vpop.f32.mrf.mxu0 }
 0x11d   :  { %v2736_v37 = vrot.slane %v2557_v0, %v4302_v27  ;;  %v2307_v20 = vpop.permute.xlu0 %2306  ;;  %3825 = vmatprep.mubr.msk.bf16.mxu0 %vm4027_vm1, %v4026_v5  ;;  %v3207_v28 = vrot.slane %v3199_v53, %v4302_v27  ;;  %v259_v38 = vsel %vm243_vm6, %v212_v55, 0.0  ;;  %v310_v29 = vadd.f32 %v309_v42, %v308_v4 }
 0x11e   :  { %v2497_v47 = vsel %vm528_vm3, %v2181_v7, %v2307_v20  ;;  %v254_v7 = vadd.f32 %v253_v54, %v252_v40  ;;  %v290_v34 = vmul.f32 %v212_v55, %v212_v55 }
 0x11f   :  { %v2737_v31 = vcombine.high %v2736_v37, %v2736_v37  ;;  %v2744_v46 = vrot.slane %v2736_v37, %v4302_v27  ;;  %v2183_v10 = vpop.permute.xlu1 %2182  ;;  %v3780_v37 = vpop.f32.mrf.mxu0 }
 0x120   :  { %v256_v39 = vadd.f32 %v255_v2, %v254_v7  ;;  %v293_v63 = vmul.f32 %v3780_v37, %v3780_v37  ;;  %v265_v25 = vsel %vm243_vm6, %v3780_v37, 0.0 }
 0x121   :  { %v4809_v1 = vrot.slane %v2737_v31, %v4302_v27  ;;  %v2752_v24 = vcombine.high %v2744_v46, %v2744_v46  ;;  %v3169_v3 = vcombine.low %v3710_v19, %v2744_v46  ;;  %v2335_v43 = vpop.permute.xlu0 %2334  ;;  %v215_v19 = vpop.f32.mrf.mxu0  ;;  %v312_v31 = vadd.f32 %v311_v45, %v310_v29 }
 0x122   :  { %v2531_v49 = vsel %vm577_vm4, %v2497_v47, %v2335_v43  ;;  %v258_v58 = vadd.f32 %v257_v56, %v256_v39  ;;  %v313_v47 = vsel %vm243_vm6, %v290_v34, 0.0  ;;  %v261_v9 = vsel %vm243_vm6, %v215_v19, 0.0 }
 0x123   :  { %v3170_v22 = vcombine.low %v4809_v1, %v2752_v24  ;;  %v2309_v61 = vpop.permute.xlu1 %2308  ;;  %v3191_v16 = vrot.slane %v3169_v3, %v4302_v27  ;;  %v3783_v13 = vpop.f32.mrf.mxu0  ;;  %v314_v3 = vadd.f32 %v313_v47, %v312_v31  ;;  %v319_v33 = vsel %vm243_vm6, %v293_v63, 0.0 }
 0x124   :  { %v260_v62 = vadd.f32 %v259_v38, %v258_v58  ;;  %v2500_v46 = vsel %vm528_vm3, %v2183_v10, %v2309_v61  ;;  %v292_v10 = vmul.f32 %v3779_v26, %v3779_v26  ;;  %v291_v61 = vmul.f32 %v215_v19, %v215_v19 }
 0x125   :  { %v3198_v59 = vrot.slane %v3170_v22, %v4302_v27  ;;  %v2461_v30 = vpop.permute.xlu0 %2460  ;;  %v228_v43 = vpop.f32.mrf.mxu0  ;;  %v296_v39 = vmul.f32 %v3783_v13, %v3783_v13 }
 0x126   :  { %v2559_v44 = vsel %vm594_vm5, %v2531_v49, %v2461_v30  ;;  %v262_v22 = vadd.f32 %v261_v9, %v260_v62  ;;  %v317_v40 = vsel %vm243_vm6, %v292_v10, 0.0  ;;  %v267_v7 = vsel %vm243_vm6, %v228_v43, 0.0 }
 0x127   :  { %v3200_v57 = vcombine.low %v3191_v16, %v3198_v59  ;;  %v2760_v8 = vrot.slane %v2559_v44, %v4302_v27  ;;  %v2337_v32 = vpop.permute.xlu1 %2336  ;;  %v2753_v16 = vcombine.high %v4809_v1, %v4809_v1  ;;  %v315_v59 = vsel %vm243_vm6, %v291_v61, 0.0  ;;  %v3784_v30 = vpop.f32.mrf.mxu0 }
 0x128   :  { %v2533_v52 = vsel %vm577_vm4, %v2500_v46, %v2337_v32  ;;  %v264_v54 = vadd.f32 %v263_v50, %v262_v22  ;;  %v316_v26 = vadd.f32 %v315_v59, %v314_v3  ;;  %v273_v31 = vsel %vm243_vm6, %v3784_v30, 0.0 }
 0x129   :  { %v2761_v60 = vcombine.high %v2760_v8, %v2760_v8  ;;  %v2185_v41 = vpop.permute.xlu0 %2184  ;;  %v3214_v0 = vrot.slane %v3200_v57, %v4302_v27  ;;  %v4828_v20 = vrot.slane %v2760_v8, %v4302_v27  ;;  %v294_v57 = vmul.f32 %v228_v43, %v228_v43 }
 0x12a   :  { %v266_v42 = vadd.f32 %v265_v25, %v264_v54  ;;  %v318_v48 = vadd.f32 %v317_v40, %v316_v26 }
 0x12b   :  { %v2463_v35 = vpop.permute.xlu1 %2462  ;;  %v2775_v12 = vrot.slane %v2761_v60, %v4302_v27  ;;  %v3215_v21 = vcombine.low %v3207_v28, %v3214_v0  ;;  %v2776_v6 = vcombine.high %v4828_v20, %v4828_v20  ;;  %v2972_v51 = vunpack.i.h.s16 %v4828_v20  ;;  %v231_v0 = vpop.f32.mrf.mxu0 }
 0x12c   :  { %v2561_v11 = vsel %vm594_vm5, %v2533_v52, %v2463_v35  ;;  %v271_v28 = vsel %vm243_vm6, %v3783_v13, 0.0  ;;  %v268_v4 = vadd.f32 %v267_v7, %v266_v42  ;;  %v321_v60 = vsel %vm243_vm6, %v294_v57, 0.0 }
 0x12d   :  { %v1794_v14 = vpop.permute.xlu0 %1793  ;;  %3856 = vmatmul.mubr.msk.bf16.gmra.mxu1 %vm117_vm2, %v3215_v21  ;;  %v2974_v17 = vunpack.i.h.s16 %v2775_v12  ;;  %v2777_v53 = vcombine.high %v2775_v12, %v2775_v12  ;;  %v2976_v2 = vunpack.i.h.s16 %v2776_v6  ;;  %v2784_v23 = vrot.slane %v2561_v11, %v4302_v27 }
 0x12e   :  { %3859 = vmatprep.mubr.msk.bf16.mxu1 %vm4027_vm1, %v4026_v5  ;;  %v3712_v18 = vpack.i.b16 %v2775_v12, %v2972_v51  ;;  %v320_v37 = vadd.f32 %v319_v33, %v318_v48  ;;  %v269_v29 = vsel %vm243_vm6, %v231_v0, 0.0  ;;  %v295_v35 = vmul.f32 %v231_v0, %v231_v0 }
 0x12f   :  { %v2311_v24 = vpop.permute.xlu1 %2310  ;;  %v3713_v36 = vpack.i.b16 %v2776_v6, %v2974_v17  ;;  %v3714_v8 = vpack.i.b16 %v2777_v53, %v2976_v2  ;;  %v2785_v1 = vcombine.high %v2784_v23, %v2784_v23  ;;  %v270_v34 = vadd.f32 %v269_v29, %v268_v4 }
 0x130   :  { %v2503_v32 = vsel %vm528_vm3, %v2185_v41, %v2311_v24  ;;  %v297_v41 = vmul.f32 %v3784_v30, %v3784_v30  ;;  %v322_v62 = vadd.f32 %v321_v60, %v320_v37  ;;  %v325_v13 = vsel %vm243_vm6, %v296_v39, 0.0 }
 0x131   :  { %v1864_v15 = vpop.permute.xlu0 %1863  ;;  %v2799_v19 = vrot.slane %v2785_v1, %v4302_v27  ;;  %v272_v6 = vadd.f32 %v271_v28, %v270_v34  ;;  %v323_v52 = vsel %vm243_vm6, %v295_v35, 0.0  ;;  %v3711_v47 = vpack.i.b16 %v4828_v20, %v2753_v16 }
 0x132   :  { %v1906_v44 = vsel %vm577_vm4, %v1794_v14, %v1864_v15  ;;  %v2792_v9 = vrot.slane %v2784_v23, %v4302_v27  ;;  %v324_v24 = vadd.f32 %v323_v52, %v322_v62  ;;  %v3217_v10 = vcombine.low %v3713_v36, %v3714_v8 }
 0x133   :  { %v1796_v49 = vpop.permute.xlu1 %1795  ;;  %v1929_v45 = vsel %vm594_vm5, %v1906_v44, %v1864_v15  ;;  %v327_v43 = vsel %vm243_vm6, %v297_v41, 0.0  ;;  %v4872_v51 = vadd.f32 %v273_v31, %v272_v6  ;;  %v3216_v20 = vcombine.low %v3711_v47, %v3712_v18 }
 0x134   :  { %v326_v50 = vadd.f32 %v325_v13, %v324_v24  ;;  %v2801_v63 = vcombine.high %v2799_v19, %v2799_v19  ;;  %v2800_v53 = vcombine.high %v2792_v9, %v2792_v9  ;;  %v3218_v2 = vcombine.low %v2792_v9, %v2799_v19 }
 0x135   :  { %v3233_v25 = vrot.slane %v3217_v10, %v4302_v27  ;;  %v3226_v40 = vrot.slane %v3216_v20, %v4302_v27 }
 0x136   :  { %v2339_v56 = vpop.permute.xlu0 %2338  ;;  %v4875_v61 = vadd.f32 %v327_v43, %v326_v50  ;;  %v3240_v18 = vrot.slane %v3218_v2, %v4302_v27 }
 0x137   :  { %v1866_v55 = vpop.permute.xlu1 %1865  ;;  %v2535_v46 = vsel %vm577_vm4, %v2503_v32, %v2339_v56  ;;  %v3248_v33 = vcombine.low %v3226_v40, %v3233_v25 }
 0x138   :  { %v1908_v38 = vsel %vm577_vm4, %v1796_v49, %v1866_v55 }
 0x139   :  { %v1930_v58 = vsel %vm594_vm5, %v1908_v38, %v1866_v55  ;;  %v3256_v48 = vrot.slane %v3248_v33, %v4302_v27 }
 0x13a   :  { %v3687_v12 = vcombine.low %v1929_v45, %v1930_v58  ;;  %v2187_v21 = vpop.permute.xlu0 %2186 }
 0x13b   :  { %v2465_v14 = vpop.permute.xlu1 %2464 }
 0x13c   :  { %v2563_v11 = vsel %vm594_vm5, %v2535_v46, %v2465_v14  ;;  %3826 = vmatmul.mubr.msk.bf16.gmra.mxu0 %vm117_vm2, %v3687_v12 }
 0x13d   :  { %v2808_v3 = vrot.slane %v2563_v11, %v4302_v27  ;;  %3829 = vmatprep.mubr.msk.bf16.mxu0 %vm4027_vm1, %v4026_v5 }
 0x13e   :  { %v2341_v17 = vpop.permute.xlu0 %2340 }
 0x13f   :  { %v2816_v15 = vrot.slane %v2808_v3, %v4302_v27  ;;  %v2313_v22 = vpop.permute.xlu1 %2312  ;;  %v2809_v16 = vcombine.high %v2808_v3, %v2808_v3 }
 0x140   :  { %v2506_v30 = vsel %vm528_vm3, %v2187_v21, %v2313_v22 }
 0x141   :  { %v3715_v23 = vpack.i.b16 %v2816_v15, %v2801_v63  ;;  %v2823_v26 = vrot.slane %v2809_v16, %v4302_v27  ;;  %v2824_v44 = vcombine.high %v2816_v15, %v2816_v15  ;;  %v2537_v57 = vsel %vm577_vm4, %v2506_v30, %v2341_v17 }
 0x142   :  { %v2315_v49 = vpop.permute.xlu0 %2314  ;;  %v2986_v0 = vunpack.i.h.s16 %v2816_v15 }
 0x143   :  { %v3219_v54 = vcombine.low %v2800_v53, %v3715_v23  ;;  %v2189_v59 = vpop.permute.xlu1 %2188  ;;  %v2988_v28 = vunpack.i.h.s16 %v2823_v26  ;;  %v2825_v39 = vcombine.high %v2823_v26, %v2823_v26  ;;  %v2990_v4 = vunpack.i.h.s16 %v2824_v44 }
 0x144   :  { %v2509_v32 = vsel %vm528_vm3, %v2189_v59, %v2315_v49  ;;  %v3716_v62 = vpack.i.b16 %v2823_v26, %v2986_v0 }
 0x145   :  { %v3247_v36 = vrot.slane %v3219_v54, %v4302_v27  ;;  %v3717_v35 = vpack.i.b16 %v2824_v44, %v2988_v28  ;;  %v3718_v19 = vpack.i.b16 %v2825_v39, %v2990_v4 }
 0x146   :  { %v2343_v42 = vpop.permute.xlu0 %2342 }
 0x147   :  { %v2467_v7 = vpop.permute.xlu1 %2466  ;;  %v3249_v8 = vcombine.low %v3240_v18, %v3247_v36  ;;  %v2539_v29 = vsel %vm577_vm4, %v2509_v32, %v2343_v42  ;;  %v3265_v47 = vcombine.low %v3716_v62, %v3717_v35 }
 0x148   :  { %v2565_v1 = vsel %vm594_vm5, %v2537_v57, %v2467_v7 }
 0x149   :  { %v2832_v56 = vrot.slane %v2565_v1, %v4302_v27  ;;  %v3263_v55 = vrot.slane %v3249_v8, %v4302_v27  ;;  %v3275_v15 = vrot.slane %v3265_v47, %v4302_v27 }
 0x14a   :  { %v1798_v60 = vpop.permute.xlu0 %1797 }
 0x14b   :  { %v2833_v45 = vcombine.high %v2832_v56, %v2832_v56  ;;  %v2840_v38 = vrot.slane %v2832_v56, %v4302_v27  ;;  %v3264_v37 = vcombine.low %v3256_v48, %v3263_v55  ;;  %v2469_v58 = vpop.permute.xlu1 %2468 }
 0x14c   :  { %v2567_v34 = vsel %vm594_vm5, %v2539_v29, %v2469_v58 }
 0x14d   :  { %v2847_v41 = vrot.slane %v2833_v45, %v4302_v27  ;;  %3860 = vmatmul.mubr.msk.bf16.gmra.mxu1 %vm117_vm2, %v3264_v37  ;;  %v2856_v12 = vrot.slane %v2567_v34, %v4302_v27  ;;  %v2848_v31 = vcombine.high %v2840_v38, %v2840_v38  ;;  %v3266_v14 = vcombine.low %v3718_v19, %v2840_v38 }
 0x14e   :  { %v1868_v21 = vpop.permute.xlu0 %1867  ;;  %3863 = vmatprep.mubr.msk.bf16.mxu1 %vm4027_vm1, %v4026_v5 }
 0x14f   :  { %v2849_v46 = vcombine.high %v2847_v41, %v2847_v41  ;;  %v2857_v13 = vcombine.high %v2856_v12, %v2856_v12  ;;  %v2864_v6 = vrot.slane %v2856_v12, %v4302_v27  ;;  %v1800_v52 = vpop.permute.xlu1 %1799  ;;  %v1910_v24 = vsel %vm577_vm4, %v1798_v60, %v1868_v21 }
 0x150   :  { %v3267_v10 = vcombine.low %v2847_v41, %v2848_v31  ;;  %v3282_v3 = vrot.slane %v3266_v14, %v4302_v27  ;;  %v1931_v53 = vsel %vm594_vm5, %v1910_v24, %v1868_v21 }
 0x151   :  { %v2871_v9 = vrot.slane %v2857_v13, %v4302_v27  ;;  %v3000_v11 = vunpack.i.h.s16 %v2864_v6  ;;  %v3719_v43 = vpack.i.b16 %v2864_v6, %v2849_v46  ;;  %v2872_v57 = vcombine.high %v2864_v6, %v2864_v6 }
 0x152   :  { %v3289_v25 = vrot.slane %v3267_v10, %v4302_v27  ;;  %v3297_v16 = vcombine.low %v3275_v15, %v3282_v3 }
 0x153   :  { %v3720_v17 = vpack.i.b16 %v2871_v9, %v3000_v11  ;;  %v2191_v50 = vpop.permute.xlu0 %2190  ;;  %v3002_v56 = vunpack.i.h.s16 %v2871_v9  ;;  %v2873_v39 = vcombine.high %v2871_v9, %v2871_v9  ;;  %v3004_v4 = vunpack.i.h.s16 %v2872_v57 }
 0x154   :  { %v1870_v20 = vpop.permute.xlu1 %1869  ;;  %v3305_v18 = vrot.slane %v3297_v16, %v4302_v27 }
 0x155   :  { %v1912_v63 = vsel %vm577_vm4, %v1800_v52, %v1870_v20  ;;  %v3268_v22 = vcombine.low %v3719_v43, %v3720_v17  ;;  %v3721_v29 = vpack.i.b16 %v2872_v57, %v3002_v56  ;;  %v3722_v34 = vpack.i.b16 %v2873_v39, %v3004_v4 }
 0x156   :  { %v1932_v2 = vsel %vm594_vm5, %v1912_v63, %v1870_v20 }
 0x157   :  { %v3688_v23 = vcombine.low %v1931_v53, %v1932_v2  ;;  %v3296_v49 = vrot.slane %v3268_v22, %v4302_v27  ;;  %v2317_v40 = vpop.permute.xlu0 %2316  ;;  %v3314_v52 = vcombine.low %v3721_v29, %v3722_v34 }
 0x158   :  { %v2193_v54 = vpop.permute.xlu1 %2192  ;;  %v2512_v33 = vsel %vm528_vm3, %v2191_v50, %v2317_v40 }
 0x159   :  { %3830 = vmatmul.mubr.msk.bf16.gmra.mxu0 %vm117_vm2, %v3688_v23  ;;  %v3298_v59 = vcombine.low %v3289_v25, %v3296_v49  ;;  %v3324_v53 = vrot.slane %v3314_v52, %v4302_v27 }
 0x15a   :  { %3833 = vmatprep.mubr.msk.bf16.mxu0 %vm4027_vm1, %v4026_v5 }
 0x15b   :  { %v3312_v36 = vrot.slane %v3298_v59, %v4302_v27 }
 0x15c   :  { %v2345_v30 = vpop.permute.xlu0 %2344 }
 0x15d   :  { %v2319_v26 = vpop.permute.xlu1 %2318  ;;  %v3313_v44 = vcombine.low %v3305_v18, %v3312_v36  ;;  %v2541_v42 = vsel %vm577_vm4, %v2512_v33, %v2345_v30 }
 0x15e   :  { %v2515_v48 = vsel %vm528_vm3, %v2193_v54, %v2319_v26 }
 0x15f   :  { %3864 = vmatmul.mubr.msk.bf16.gmra.mxu1 %vm117_vm2, %v3313_v44 }
 0x160   :  { %v2471_v7 = vpop.permute.xlu0 %2470  ;;  %3867 = vmatprep.mubr.msk.bf16.mxu1 %vm4027_vm1, %v4026_v5 }
 0x161   :  { %v2569_v8 = vsel %vm594_vm5, %v2541_v42, %v2471_v7  ;;  %v2347_v1 = vpop.permute.xlu1 %2346 }
 0x162   :  { %v2880_v32 = vrot.slane %v2569_v8, %v4302_v27  ;;  %v2543_v60 = vsel %vm577_vm4, %v2515_v48, %v2347_v1 }
 0x164   :  { %v2881_v55 = vcombine.high %v2880_v32, %v2880_v32  ;;  %v1802_v28 = vpop.permute.xlu0 %1801  ;;  %v2888_v58 = vrot.slane %v2880_v32, %v4302_v27 }
 0x165   :  { %v2473_v0 = vpop.permute.xlu1 %2472 }
 0x166   :  { %v2895_v45 = vrot.slane %v2881_v55, %v4302_v27  ;;  %v2571_v38 = vsel %vm594_vm5, %v2543_v60, %v2473_v0  ;;  %v2896_v47 = vcombine.high %v2888_v58, %v2888_v58 }
 0x167   :  { %v2904_v37 = vrot.slane %v2571_v38, %v4302_v27 }
 0x168   :  { %v1872_v41 = vpop.permute.xlu0 %1871  ;;  %v2897_v35 = vcombine.high %v2895_v45, %v2895_v45  ;;  %v3315_v62 = vcombine.low %v2888_v58, %v2895_v45 }
 0x169   :  { %v2905_v19 = vcombine.high %v2904_v37, %v2904_v37  ;;  %v2912_v12 = vrot.slane %v2904_v37, %v4302_v27  ;;  %v1804_v21 = vpop.permute.xlu1 %1803  ;;  %v1914_v13 = vsel %vm577_vm4, %v1802_v28, %v1872_v41 }
 0x16a   :  { %v3331_v10 = vrot.slane %v3315_v62, %v4302_v27  ;;  %v1933_v3 = vsel %vm594_vm5, %v1914_v13, %v1872_v41 }
 0x16b   :  { %v2919_v31 = vrot.slane %v2905_v19, %v4302_v27  ;;  %v3014_v46 = vunpack.i.h.s16 %v2912_v12  ;;  %v3723_v14 = vpack.i.b16 %v2912_v12, %v2897_v35  ;;  %v2920_v9 = vcombine.high %v2912_v12, %v2912_v12 }
 0x16c   :  { %v1806_v6 = vpop.permute.xlu0 %1805  ;;  %v3346_v25 = vcombine.low %v3324_v53, %v3331_v10 }
 0x16d   :  { %v3016_v11 = vunpack.i.h.s16 %v2919_v31  ;;  %v1874_v24 = vpop.permute.xlu1 %1873  ;;  %v3724_v17 = vpack.i.b16 %v2919_v31, %v3014_v46  ;;  %v3316_v20 = vcombine.low %v2896_v47, %v3723_v14  ;;  %v2921_v59 = vcombine.high %v2919_v31, %v2919_v31 }
 0x16e   :  { %v1916_v43 = vsel %vm577_vm4, %v1804_v21, %v1874_v24  ;;  %v3018_v30 = vunpack.i.h.s16 %v2920_v9  ;;  %v3354_v42 = vrot.slane %v3346_v25, %v4302_v27 }
 0x16f   :  { %v3725_v50 = vpack.i.b16 %v2920_v9, %v3016_v11  ;;  %v1934_v63 = vsel %vm594_vm5, %v1916_v43, %v1874_v24  ;;  %v3338_v16 = vrot.slane %v3316_v20, %v4302_v27 }
 0x170   :  { %v3689_v15 = vcombine.low %v1933_v3, %v1934_v63  ;;  %v1876_v22 = vpop.permute.xlu0 %1875  ;;  %v3726_v48 = vpack.i.b16 %v2921_v59, %v3018_v30 }
 0x171   :  { %v3317_v2 = vcombine.low %v3724_v17, %v3725_v50  ;;  %v1808_v23 = vpop.permute.xlu1 %1807  ;;  %v1918_v40 = vsel %vm577_vm4, %v1806_v6, %v1876_v22 }
 0x172   :  { %3834 = vmatmul.mubr.msk.bf16.gmra.mxu0 %vm117_vm2, %v3689_v15  ;;  %v1935_v26 = vsel %vm594_vm5, %v1918_v40, %v1876_v22  ;;  %v3369_v60 = vrot.slane %v3726_v48, %v4302_v27 }
 0x173   :  { %3837 = vmatprep.mubr.msk.bf16.mxu0 %vm4027_vm1, %v4026_v5  ;;  %v3345_v49 = vrot.slane %v3317_v2, %v4302_v27 }
 0x174   :  { %v1810_v54 = vpop.permute.xlu0 %1809  ;;  %v3376_v58 = vrot.slane %v3369_v60, %v4302_v27 }
 0x175   :  { %v1878_v18 = vpop.permute.xlu1 %1877  ;;  %v3347_v36 = vcombine.low %v3338_v16, %v3345_v49 }
 0x176   :  { %v1920_v33 = vsel %vm577_vm4, %v1808_v23, %v1878_v18 }
 0x177   :  { %v1936_v44 = vsel %vm594_vm5, %v1920_v33, %v1878_v18  ;;  %v3361_v7 = vrot.slane %v3347_v36, %v4302_v27 }
 0x178   :  { %v1585_v57 = vpop.f32.mrf.mxu1  ;;  %v3690_v8 = vcombine.low %v1935_v26, %v1936_v44  ;;  %v1880_v32 = vpop.permute.xlu0 %1879 }
 0x179   :  { %v1812_v1 = vpop.permute.xlu1 %1811  ;;  %v3362_v56 = vcombine.low %v3354_v42, %v3361_v7  ;;  %v1922_v39 = vsel %vm577_vm4, %v1810_v54, %v1880_v32  ;;  %v1668_v3 = vmul.f32 %v1585_v57, %v1585_v57  ;;  %v1635_v22 = vsel %vm243_vm6, %v1585_v57, 0.0 }
 0x17a   :  { %v3793_v55 = vpop.f32.mrf.mxu1  ;;  %3838 = vmatmul.mubr.msk.bf16.gmra.mxu0 %vm117_vm2, %v3690_v8  ;;  %v1937_v38 = vsel %vm594_vm5, %v1922_v39, %v1880_v32 }
 0x17b   :  { %3868 = vmatmul.mubr.msk.bf16.gmra.mxu1 %vm117_vm2, %v3362_v56  ;;  %3841 = vmatprep.mubr.msk.bf16.mxu0 %vm4027_vm1, %v4026_v5  ;;  %v1683_v49 = vsel %vm243_vm6, %v1668_v3, 0.0 }
 0x17c   :  { %v1588_v28 = vpop.f32.mrf.mxu1  ;;  %3871 = vmatprep.mubr.msk.bf16.mxu1 %vm4027_vm1, %v4026_v5 }
 0x17d   :  { %v1882_v4 = vpop.permute.xlu1 %1881  ;;  %v1669_v53 = vmul.f32 %v1588_v28, %v1588_v28  ;;  %v1637_v40 = vsel %vm243_vm6, %v1588_v28, 0.0 }
 0x17e   :  { %v3794_v0 = vpop.f32.mrf.mxu1  ;;  %v1924_v45 = vsel %vm577_vm4, %v1812_v1, %v1882_v4 }
 0x17f   :  { %v1938_v37 = vsel %vm594_vm5, %v1924_v45, %v1882_v4  ;;  %v1685_v36 = vsel %vm243_vm6, %v1669_v53, 0.0  ;;  %v275_v4 = vrot.slane %v4872_v51, 4 }
 0x180   :  { %v3691_v29 = vcombine.low %v1937_v38, %v1938_v37 }
 0x182   :  { %3842 = vmatmul.mubr.msk.bf16.gmra.mxu0 %vm117_vm2, %v3691_v29 }
 0x183   :  { %v1593_v41 = vpop.f32.mrf.mxu1  ;;  %3872 = vmatmul.mubr.msk.bf16.gmra.mxu1 %vm117_vm2, %v3376_v58 }
 0x184   :  { %v1670_v54 = vmul.f32 %v1593_v41, %v1593_v41  ;;  %v1639_v33 = vsel %vm243_vm6, %v1593_v41, 0.0 }
 0x185   :  { %v3797_v34 = vpop.f32.mrf.mxu1 }
 0x186   :  { %v1687_v57 = vsel %vm243_vm6, %v1670_v54, 0.0 }
 0x187   :  { %v1596_v35 = vpop.f32.mrf.mxu1 }
 0x188   :  { %v1671_v26 = vmul.f32 %v1596_v35, %v1596_v35  ;;  %v1641_v8 = vsel %vm243_vm6, %v1596_v35, 0.0 }
 0x189   :  { %v3798_v19 = vpop.f32.mrf.mxu1 }
 0x18a   :  { %v1689_v55 = vsel %vm243_vm6, %v1671_v26, 0.0 }
 0x197   :  { %v1601_v12 = vpop.f32.mrf.mxu1 }
 0x198   :  { %v1672_v1 = vmul.f32 %v1601_v12, %v1601_v12  ;;  %v1643_v28 = vsel %vm243_vm6, %v1601_v12, 0.0  ;;  %v276_v12 = vadd.f32 %v275_v4, %v4872_v51 }
 0x199   :  { %v3801_v21 = vpop.f32.mrf.mxu1 }
 0x19a   :  { %v1691_v38 = vsel %vm243_vm6, %v1672_v1, 0.0  ;;  %v277_v3 = vrot.slane %v276_v12, 2 }
 0x19b   :  { %v1604_v62 = vpop.f32.mrf.mxu1 }
 0x19c   :  { %v1673_v39 = vmul.f32 %v1604_v62, %v1604_v62  ;;  %v1645_v37 = vsel %vm243_vm6, %v1604_v62, 0.0 }
 0x19d   :  { %v3802_v31 = vpop.f32.mrf.mxu1 }
 0x19e   :  { %v1693_v34 = vsel %vm243_vm6, %v1673_v39, 0.0  ;;  %v329_v31 = vrot.slane %v4875_v61, 4 }
 0x19f   :  { %v1609_v46 = vpop.f32.mrf.mxu1 }
 0x1a0   :  { %v1674_v29 = vmul.f32 %v1609_v46, %v1609_v46  ;;  %v1647_v35 = vsel %vm243_vm6, %v1609_v46, 0.0 }
 0x1a1   :  { %v3805_v14 = vpop.f32.mrf.mxu1 }
 0x1a3   :  { %v1612_v13 = vpop.f32.mrf.mxu1 }
 0x1a4   :  { %v1675_v19 = vmul.f32 %v1612_v13, %v1612_v13  ;;  %v1649_v62 = vsel %vm243_vm6, %v1612_v13, 0.0 }
 0x1a5   :  { %v3806_v6 = vpop.f32.mrf.mxu1 }
 0x1a9   :  { %v4958_v52 = vpop.f32.mrf.mxu1  ;;  %v1577_v47 = vpop.f32.mrf.mxu0 }
 0x1aa   :  { %v1666_v24 = vmul.f32 %v1577_v47, %v1577_v47  ;;  %v1632_v17 = vsel %vm243_vm6, %v1577_v47, 0.0  ;;  %v1676_v21 = vmul.f32 %v4958_v52, %v4958_v52  ;;  %v1695_v47 = vsel %vm243_vm6, %v1674_v29, 0.0 }
 0x1ab   :  { %v3809_v27 = vpop.f32.mrf.mxu1  ;;  %v3789_v9 = vpop.f32.mrf.mxu0  ;;  %v1651_v51 = vsel %vm243_vm6, %v4958_v52, 0.0 }
 0x1ac   :  { %v1680_v2 = vsel %vm243_vm6, %v1666_v24, 0.0 }
 0x1ad   :  { %v4960_v11 = vpop.f32.mrf.mxu1  ;;  %v1580_v10 = vpop.f32.mrf.mxu0 }
 0x1ae   :  { %v1633_v50 = vsel %vm243_vm6, %v1580_v10, 0.0  ;;  %v1667_v20 = vmul.f32 %v1580_v10, %v1580_v10  ;;  %v1677_v27 = vmul.f32 %v4960_v11, %v4960_v11  ;;  %v1697_v10 = vsel %vm243_vm6, %v1675_v19, 0.0 }
 0x1af   :  { %v3810_v43 = vpop.f32.mrf.mxu1  ;;  %v1634_v63 = vadd.f32 %v1633_v50, %v1632_v17  ;;  %v3790_v15 = vpop.f32.mrf.mxu0  ;;  %v1699_v50 = vsel %vm243_vm6, %v1676_v21, 0.0 }
 0x1b0   :  { %v1681_v23 = vsel %vm243_vm6, %v1667_v20, 0.0  ;;  %v330_v20 = vadd.f32 %v329_v31, %v4875_v61  ;;  %v1653_v15 = vsel %vm243_vm6, %v4960_v11, 0.0 }
 0x1b1   :  { %v1636_v25 = vadd.f32 %v1635_v22, %v1634_v63  ;;  %v1682_v16 = vadd.f32 %v1681_v23, %v1680_v2  ;;  %v1701_v22 = vsel %vm243_vm6, %v1677_v27, 0.0 }
 0x1b3   :  { %v1625_v59 = vpop.f32.mrf.mxu1  ;;  %v1638_v30 = vadd.f32 %v1637_v40, %v1636_v25  ;;  %v1684_v18 = vadd.f32 %v1683_v49, %v1682_v16 }
 0x1b4   :  { %v1678_v53 = vmul.f32 %v1625_v59, %v1625_v59  ;;  %v1655_v54 = vsel %vm243_vm6, %v1625_v59, 0.0  ;;  %v331_v59 = vrot.slane %v330_v20, 2 }
 0x1b5   :  { %v3813_v44 = vpop.f32.mrf.mxu1  ;;  %v1640_v42 = vadd.f32 %v1639_v33, %v1638_v30  ;;  %v1686_v7 = vadd.f32 %v1685_v36, %v1684_v18 }
 0x1b6   :  { %v332_v29 = vadd.f32 %v331_v59, %v330_v20 }
 0x1b7   :  { %v1628_v32 = vpop.f32.mrf.mxu1  ;;  %v1642_v56 = vadd.f32 %v1641_v8, %v1640_v42  ;;  %v1688_v48 = vadd.f32 %v1687_v57, %v1686_v7  ;;  %v1703_v42 = vsel %vm243_vm6, %v1678_v53, 0.0 }
 0x1b8   :  { %v1679_v61 = vmul.f32 %v1628_v32, %v1628_v32  ;;  %v1657_v7 = vsel %vm243_vm6, %v1628_v32, 0.0  ;;  %v333_v31 = vrot.slane %v332_v29, 1 }
 0x1b9   :  { %v3814_v60 = vpop.f32.mrf.mxu1  ;;  %v1644_v0 = vadd.f32 %v1643_v28, %v1642_v56  ;;  %v1690_v45 = vadd.f32 %v1689_v55, %v1688_v48 }
 0x1ba   :  { %v1705_v55 = vsel %vm243_vm6, %v1679_v61, 0.0  ;;  %v278_v60 = vadd.f32 %v277_v3, %v276_v12  ;;  %v334_v27 = vadd.f32 %v333_v31, %v332_v29 }
 0x1bb   :  { %v1692_v58 = vadd.f32 %v1691_v38, %v1690_v45  ;;  %v1646_v41 = vadd.f32 %v1645_v37, %v1644_v0 }
 0x1bd   :  { %v1648_v14 = vadd.f32 %v1647_v35, %v1646_v41  ;;  %v1694_v6 = vadd.f32 %v1693_v34, %v1692_v58  ;;  %v279_v35 = vrot.slane %v278_v60, 1 }
 0x1bf   :  { %v3432_v9 = vpop.f32.mrf.mxu1  ;;  %v1650_v24 = vadd.f32 %v1649_v62, %v1648_v14  ;;  %v1696_v46 = vadd.f32 %v1695_v47, %v1694_v6  ;;  %v280_v47 = vadd.f32 %v279_v35, %v278_v60 }
 0x1c0   :  { %v3519_v43 = vmul.f32 %v3432_v9, %v3432_v9  ;;  %v3486_v2 = vsel %vm243_vm6, %v3432_v9, 0.0 }
 0x1c1   :  { %v3849_v17 = vpop.f32.mrf.mxu1  ;;  %v1652_v63 = vadd.f32 %v1651_v51, %v1650_v24  ;;  %v1698_v13 = vadd.f32 %v1697_v10, %v1696_v46 }
 0x1c2   :  { %v3532_v30 = vsel %vm243_vm6, %v3519_v43, 0.0 }
 0x1c3   :  { %v3435_v23 = vpop.f32.mrf.mxu1  ;;  %v1654_v25 = vadd.f32 %v1653_v15, %v1652_v63  ;;  %v1700_v52 = vadd.f32 %v1699_v50, %v1698_v13 }
 0x1c4   :  { %v3487_v16 = vsel %vm243_vm6, %v3435_v23, 0.0  ;;  %v3520_v49 = vmul.f32 %v3435_v23, %v3435_v23  ;;  %v2029_v40 = vpop.f32.mrf.mxu0 }
 0x1c5   :  { %v3488_v18 = vadd.f32 %v3487_v16, %v3486_v2  ;;  %v3850_v36 = vpop.f32.mrf.mxu1  ;;  %v1656_v11 = vadd.f32 %v1655_v54, %v1654_v25  ;;  %v1702_v33 = vadd.f32 %v1701_v22, %v1700_v52  ;;  %v2118_v8 = vmul.f32 %v2029_v40, %v2029_v40 }
 0x1c6   :  { %v3533_v26 = vsel %vm243_vm6, %v3520_v49, 0.0  ;;  %v3819_v44 = vpop.f32.mrf.mxu0  ;;  %v2084_v28 = vsel %vm243_vm6, %v2029_v40, 0.0 }
 0x1c7   :  { %v3534_v57 = vadd.f32 %v3533_v26, %v3532_v30  ;;  %v1704_v1 = vadd.f32 %v1703_v42, %v1702_v33  ;;  %v1658_v56 = vadd.f32 %v1657_v7, %v1656_v11  ;;  %v2132_v37 = vsel %vm243_vm6, %v2118_v8, 0.0 }
 0x1c8   :  { %v2032_v48 = vpop.f32.mrf.mxu0 }
 0x1c9   :  { %v2085_v39 = vsel %vm243_vm6, %v2032_v48, 0.0  ;;  %v2119_v4 = vmul.f32 %v2032_v48, %v2032_v48  ;;  %v1659_v0 = vrot.slane %v1658_v56, 4  ;;  %v1706_v45 = vadd.f32 %v1705_v55, %v1704_v1 }
 0x1ca   :  { %v2086_v32 = vadd.f32 %v2085_v39, %v2084_v28  ;;  %v3820_v38 = vpop.f32.mrf.mxu0 }
 0x1cb   :  { %v2133_v5 = vsel %vm243_vm6, %v2119_v4, 0.0  ;;  %v1660_v58 = vadd.f32 %v1659_v0, %v1658_v56  ;;  %v1707_v41 = vrot.slane %v1706_v45, 4 }
 0x1cc   :  { %v2134_v34 = vadd.f32 %v2133_v5, %v2132_v37 }
 0x1cd   :  { %v1661_v19 = vrot.slane %v1660_v58, 2  ;;  %v1708_v21 = vadd.f32 %v1707_v41, %v1706_v45 }
 0x1cf   :  { %v1662_v14 = vadd.f32 %v1661_v19, %v1660_v58  ;;  %v1709_v6 = vrot.slane %v1708_v21, 2 }
 0x1d1   :  { %v1663_v12 = vrot.slane %v1662_v14, 1  ;;  %v1710_v62 = vadd.f32 %v1709_v6, %v1708_v21 }
 0x1d3   :  { %v1664_v9 = vadd.f32 %v1663_v12, %v1662_v14  ;;  %v1711_v24 = vrot.slane %v1710_v62, 1 }
 0x1d5   :  { %v5010_v46 = vadd.f32 %v1664_v9, %v280_v47  ;;  %v1712_v10 = vadd.f32 %v1711_v24, %v1710_v62  ;;  %v3440_v51 = vpop.f32.mrf.mxu1 }
 0x1d6   :  { %v3489_v3 = vsel %vm243_vm6, %v3440_v51, 0.0  ;;  %v3521_v43 = vmul.f32 %v3440_v51, %v3440_v51 }
 0x1d7   :  { %v5013_v17 = vadd.f32 %v1712_v10, %v334_v27  ;;  %v3490_v50 = vadd.f32 %v3489_v3, %v3488_v18  ;;  %v3853_v20 = vpop.f32.mrf.mxu1 }
 0x1d8   :  { %v3535_v63 = vsel %vm243_vm6, %v3521_v43, 0.0 }
 0x1d9   :  { %v3536_v13 = vadd.f32 %v3535_v63, %v3534_v57  ;;  %v3443_v15 = vpop.f32.mrf.mxu1 }
 0x1da   :  { %v3491_v22 = vsel %vm243_vm6, %v3443_v15, 0.0  ;;  %v3522_v53 = vmul.f32 %v3443_v15, %v3443_v15 }
 0x1db   :  { %v3492_v2 = vadd.f32 %v3491_v22, %v3490_v50  ;;  %v3854_v23 = vpop.f32.mrf.mxu1 }
 0x1dc   :  { %v2037_v25 = vpop.f32.mrf.mxu0  ;;  %v3537_v52 = vsel %vm243_vm6, %v3522_v53, 0.0 }
 0x1dd   :  { %v2087_v16 = vsel %vm243_vm6, %v2037_v25, 0.0  ;;  %v2120_v49 = vmul.f32 %v2037_v25, %v2037_v25  ;;  %v3538_v40 = vadd.f32 %v3537_v52, %v3536_v13 }
 0x1de   :  { %v2088_v54 = vadd.f32 %v2087_v16, %v2086_v32  ;;  %v3823_v61 = vpop.f32.mrf.mxu0 }
 0x1df   :  { %v2135_v30 = vsel %vm243_vm6, %v2120_v49, 0.0 }
 0x1e0   :  { %v2136_v18 = vadd.f32 %v2135_v30, %v2134_v34  ;;  %v2040_v36 = vpop.f32.mrf.mxu0 }
 0x1e1   :  { %v2089_v11 = vsel %vm243_vm6, %v2040_v36, 0.0  ;;  %v2121_v33 = vmul.f32 %v2040_v36, %v2040_v36 }
 0x1e2   :  { %v2090_v26 = vadd.f32 %v2089_v11, %v2088_v54  ;;  %v3824_v44 = vpop.f32.mrf.mxu0 }
 0x1e3   :  { %v2137_v42 = vsel %vm243_vm6, %v2121_v33, 0.0 }
 0x1e4   :  { %v2138_v7 = vadd.f32 %v2137_v42, %v2136_v18 }
 0x1ed   :  { %v3448_v57 = vpop.f32.mrf.mxu1 }
 0x1ee   :  { %v3493_v8 = vsel %vm243_vm6, %v3448_v57, 0.0  ;;  %v3523_v59 = vmul.f32 %v3448_v57, %v3448_v57 }
 0x1ef   :  { %v3494_v1 = vadd.f32 %v3493_v8, %v3492_v2  ;;  %v3857_v56 = vpop.f32.mrf.mxu1 }
 0x1f0   :  { %v3539_v48 = vsel %vm243_vm6, %v3523_v59, 0.0 }
 0x1f1   :  { %v3540_v55 = vadd.f32 %v3539_v48, %v3538_v40  ;;  %v3451_v28 = vpop.f32.mrf.mxu1 }
 0x1f2   :  { %v3495_v39 = vsel %vm243_vm6, %v3451_v28, 0.0  ;;  %v3524_v4 = vmul.f32 %v3451_v28, %v3451_v28 }
 0x1f3   :  { %v3496_v60 = vadd.f32 %v3495_v39, %v3494_v1  ;;  %v3858_v0 = vpop.f32.mrf.mxu1 }
 0x1f4   :  { %v3541_v45 = vsel %vm243_vm6, %v3524_v4, 0.0 }
 0x1f5   :  { %v3542_v32 = vadd.f32 %v3541_v45, %v3540_v55 }
 0x1fc   :  { %v2045_v38 = vpop.f32.mrf.mxu0 }
 0x1fd   :  { %v2122_v27 = vmul.f32 %v2045_v38, %v2045_v38  ;;  %v2091_v10 = vsel %vm243_vm6, %v2045_v38, 0.0 }
 0x1fe   :  { %v3827_v37 = vpop.f32.mrf.mxu0  ;;  %v2092_v23 = vadd.f32 %v2091_v10, %v2090_v26 }
 0x1ff   :  { %v2139_v3 = vsel %vm243_vm6, %v2122_v27, 0.0 }
 0x200   :  { %v2048_v5 = vpop.f32.mrf.mxu0  ;;  %v2140_v25 = vadd.f32 %v2139_v3, %v2138_v7 }
 0x201   :  { %v2123_v9 = vmul.f32 %v2048_v5, %v2048_v5  ;;  %v2093_v63 = vsel %vm243_vm6, %v2048_v5, 0.0 }
 0x202   :  { %v3828_v29 = vpop.f32.mrf.mxu0  ;;  %v2094_v18 = vadd.f32 %v2093_v63, %v2092_v23 }
 0x203   :  { %v2141_v15 = vsel %vm243_vm6, %v2123_v9, 0.0 }
 0x204   :  { %v2142_v36 = vadd.f32 %v2141_v15, %v2140_v25 }
 0x20d   :  { %v3456_v58 = vpop.f32.mrf.mxu1 }
 0x20e   :  { %v3525_v24 = vmul.f32 %v3456_v58, %v3456_v58  ;;  %v3497_v43 = vsel %vm243_vm6, %v3456_v58, 0.0 }
 0x20f   :  { %v3861_v41 = vpop.f32.mrf.mxu1  ;;  %v3498_v52 = vadd.f32 %v3497_v43, %v3496_v60 }
 0x210   :  { %v3543_v22 = vsel %vm243_vm6, %v3525_v24, 0.0 }
 0x211   :  { %v3459_v34 = vpop.f32.mrf.mxu1  ;;  %v3544_v11 = vadd.f32 %v3543_v22, %v3542_v32 }
 0x212   :  { %v3526_v50 = vmul.f32 %v3459_v34, %v3459_v34  ;;  %v3499_v53 = vsel %vm243_vm6, %v3459_v34, 0.0 }
 0x213   :  { %v3862_v35 = vpop.f32.mrf.mxu1  ;;  %v3500_v33 = vadd.f32 %v3499_v53, %v3498_v52 }
 0x214   :  { %v3545_v40 = vsel %vm243_vm6, %v3526_v50, 0.0 }
 0x215   :  { %v3546_v8 = vadd.f32 %v3545_v40, %v3544_v11 }
 0x219   :  { %v2053_v19 = vpop.f32.mrf.mxu0 }
 0x21a   :  { %v2124_v20 = vmul.f32 %v2053_v19, %v2053_v19  ;;  %v2095_v54 = vsel %vm243_vm6, %v2053_v19, 0.0 }
 0x21b   :  { %v3831_v21 = vpop.f32.mrf.mxu0  ;;  %v2096_v59 = vadd.f32 %v2095_v54, %v2094_v18 }
 0x21c   :  { %v2143_v61 = vsel %vm243_vm6, %v2124_v20, 0.0 }
 0x21d   :  { %v2056_v31 = vpop.f32.mrf.mxu0  ;;  %v2144_v1 = vadd.f32 %v2143_v61, %v2142_v36 }
 0x21e   :  { %v2125_v16 = vmul.f32 %v2056_v31, %v2056_v31  ;;  %v2097_v42 = vsel %vm243_vm6, %v2056_v31, 0.0 }
 0x21f   :  { %v3832_v14 = vpop.f32.mrf.mxu0  ;;  %v3464_v6 = vpop.f32.mrf.mxu1  ;;  %v2098_v0 = vadd.f32 %v2097_v42, %v2096_v59 }
 0x220   :  { %v3527_v2 = vmul.f32 %v3464_v6, %v3464_v6  ;;  %v3501_v26 = vsel %vm243_vm6, %v3464_v6, 0.0  ;;  %v2145_v56 = vsel %vm243_vm6, %v2125_v16, 0.0 }
 0x221   :  { %v3865_v47 = vpop.f32.mrf.mxu1  ;;  %v3502_v45 = vadd.f32 %v3501_v26, %v3500_v33  ;;  %v2146_v5 = vadd.f32 %v2145_v56, %v2144_v1 }
 0x222   :  { %v3547_v7 = vsel %vm243_vm6, %v3527_v2, 0.0 }
 0x223   :  { %v3467_v12 = vpop.f32.mrf.mxu1  ;;  %v3548_v32 = vadd.f32 %v3547_v7, %v3546_v8 }
 0x224   :  { %v3528_v30 = vmul.f32 %v3467_v12, %v3467_v12  ;;  %v3503_v55 = vsel %vm243_vm6, %v3467_v12, 0.0 }
 0x225   :  { %v3866_v62 = vpop.f32.mrf.mxu1  ;;  %v3504_v35 = vadd.f32 %v3503_v55, %v3502_v45 }
 0x226   :  { %v3549_v28 = vsel %vm243_vm6, %v3528_v30, 0.0 }
 0x227   :  { %v3550_v19 = vadd.f32 %v3549_v28, %v3548_v32 }
 0x232   :  { %v2061_v51 = vpop.f32.mrf.mxu0 }
 0x233   :  { %v2126_v57 = vmul.f32 %v2061_v51, %v2061_v51  ;;  %v2099_v39 = vsel %vm243_vm6, %v2061_v51, 0.0 }
 0x234   :  { %v3835_v13 = vpop.f32.mrf.mxu0  ;;  %v2100_v21 = vadd.f32 %v2099_v39, %v2098_v0 }
 0x235   :  { %v2147_v29 = vsel %vm243_vm6, %v2126_v57, 0.0 }
 0x236   :  { %v2064_v49 = vpop.f32.mrf.mxu0  ;;  %v2148_v9 = vadd.f32 %v2147_v29, %v2146_v5 }
 0x237   :  { %v2127_v4 = vmul.f32 %v2064_v49, %v2064_v49  ;;  %v2101_v58 = vsel %vm243_vm6, %v2064_v49, 0.0 }
 0x238   :  { %v3836_v44 = vpop.f32.mrf.mxu0  ;;  %v2102_v24 = vadd.f32 %v2101_v58, %v2100_v21 }
 0x239   :  { %v2149_v6 = vsel %vm243_vm6, %v2127_v4, 0.0 }
 0x23a   :  { %v2069_v48 = vpop.f32.mrf.mxu0  ;;  %v2150_v13 = vadd.f32 %v2149_v6, %v2148_v9 }
 0x23b   :  { %v3472_v60 = vpop.f32.mrf.mxu1  ;;  %v2128_v41 = vmul.f32 %v2069_v48, %v2069_v48  ;;  %v2103_v47 = vsel %vm243_vm6, %v2069_v48, 0.0 }
 0x23c   :  { %v3529_v38 = vmul.f32 %v3472_v60, %v3472_v60  ;;  %v3839_v37 = vpop.f32.mrf.mxu0  ;;  %v3505_v31 = vsel %vm243_vm6, %v3472_v60, 0.0  ;;  %v2104_v15 = vadd.f32 %v2103_v47, %v2102_v24 }
 0x23d   :  { %v3869_v34 = vpop.f32.mrf.mxu1  ;;  %v2151_v43 = vsel %vm243_vm6, %v2128_v41, 0.0  ;;  %v3506_v50 = vadd.f32 %v3505_v31, %v3504_v35 }
 0x23e   :  { %v2072_v14 = vpop.f32.mrf.mxu0  ;;  %v3551_v12 = vsel %vm243_vm6, %v3529_v38, 0.0  ;;  %v2152_v40 = vadd.f32 %v2151_v43, %v2150_v13 }
 0x23f   :  { %v2129_v62 = vmul.f32 %v2072_v14, %v2072_v14  ;;  %v3475_v27 = vpop.f32.mrf.mxu1  ;;  %v2105_v20 = vsel %vm243_vm6, %v2072_v14, 0.0  ;;  %v3552_v22 = vadd.f32 %v3551_v12, %v3550_v19 }
 0x240   :  { %v3507_v10 = vsel %vm243_vm6, %v3475_v27, 0.0  ;;  %v3530_v51 = vmul.f32 %v3475_v27, %v3475_v27  ;;  %v3840_v3 = vpop.f32.mrf.mxu0  ;;  %v2106_v54 = vadd.f32 %v2105_v20, %v2104_v15 }
 0x241   :  { %v3870_v63 = vpop.f32.mrf.mxu1  ;;  %v2153_v23 = vsel %vm243_vm6, %v2129_v62, 0.0  ;;  %v3508_v25 = vadd.f32 %v3507_v10, %v3506_v50 }
 0x242   :  { %v3553_v53 = vsel %vm243_vm6, %v3530_v51, 0.0  ;;  %v2077_v2 = vpop.f32.mrf.mxu0  ;;  %v2154_v42 = vadd.f32 %v2153_v23, %v2152_v40  ;;  %v3564_v63 = vld [vmem:[#allocation7] sm:$0x3] }
 0x243   :  { %v2107_v52 = vsel %vm243_vm6, %v2077_v2, 0.0  ;;  %v2130_v16 = vmul.f32 %v2077_v2, %v2077_v2  ;;  %v3480_v49 = vpop.f32.mrf.mxu1  ;;  %v3554_v36 = vadd.f32 %v3553_v53, %v3552_v22 }
 0x244   :  { %v3510_v61 = vsel %vm52_vm7, %v3480_v49, 0.0  ;;  %v3531_v30 = vmul.f32 %v3480_v49, %v3480_v49  ;;  %v3843_v18 = vpop.f32.mrf.mxu0  ;;  %v2108_v26 = vadd.f32 %v2107_v52, %v2106_v54 }
 0x245   :  { %v2155_v11 = vsel %vm243_vm6, %v2130_v16, 0.0  ;;  %v3511_v33 = vadd.f32 %v3510_v61, %v3508_v25  ;;  %v3873_v44 = vpop.f32.mrf.mxu1 }
 0x246   :  { %v3555_v7 = vsel %vm52_vm7, %v3531_v30, 0.0  ;;  %v2080_v57 = vpop.f32.mrf.mxu0  ;;  %v2156_v55 = vadd.f32 %v2155_v11, %v2154_v42 }
 0x247   :  { %v3512_v8 = vrot.slane %v3511_v33, 4  ;;  %v3556_v59 = vadd.f32 %v3555_v7, %v3554_v36  ;;  %v2109_v1 = vsel %vm243_vm6, %v2080_v57, 0.0  ;;  %v2131_v56 = vmul.f32 %v2080_v57, %v2080_v57  ;;  %v3483_v48 = vpop.f32.mrf.mxu1 }
 0x248   :  { %v2110_v28 = vadd.f32 %v2109_v1, %v2108_v26  ;;  %v3844_v39 = vpop.f32.mrf.mxu0 }
 0x249   :  { %v3513_v4 = vadd.f32 %v3512_v8, %v3511_v33  ;;  %v3557_v60 = vrot.slane %v3556_v59, 4  ;;  %v2157_v0 = vsel %vm243_vm6, %v2131_v56, 0.0  ;;  %v3874_v45 = vpop.f32.mrf.mxu1 }
 0x24a   :  { %v2111_v32 = vrot.slane %v2110_v28, 4  ;;  %v2158_v38 = vadd.f32 %v2157_v0, %v2156_v55 }
 0x24b   :  { %v3514_v37 = vrot.slane %v3513_v4, 2  ;;  %v3558_v5 = vadd.f32 %v3557_v60, %v3556_v59 }
 0x24c   :  { %v2112_v29 = vadd.f32 %v2111_v32, %v2110_v28  ;;  %v2159_v58 = vrot.slane %v2158_v38, 4 }
 0x24d   :  { %v3559_v41 = vrot.slane %v3558_v5, 2  ;;  %v3515_v34 = vadd.f32 %v3514_v37, %v3513_v4 }
 0x24e   :  { %v2113_v35 = vrot.slane %v2112_v29, 2  ;;  %v2160_v19 = vadd.f32 %v2159_v58, %v2158_v38 }
 0x24f   :  { %v3560_v21 = vadd.f32 %v3559_v41, %v3558_v5  ;;  %v3516_v6 = vrot.slane %v3515_v34, 1 }
 0x250   :  { %v2114_v31 = vadd.f32 %v2113_v35, %v2112_v29  ;;  %v2161_v14 = vrot.slane %v2160_v19, 2 }
 0x251   :  { %v3561_v62 = vrot.slane %v3560_v21, 1  ;;  %v3517_v24 = vadd.f32 %v3516_v6, %v3515_v34 }
 0x252   :  { %v2115_v47 = vrot.slane %v2114_v31, 1  ;;  %v2162_v12 = vadd.f32 %v2161_v14, %v2160_v19 }
 0x253   :  { %v3562_v3 = vadd.f32 %v3561_v62, %v3560_v21 }
 0x254   :  { %v2116_v27 = vadd.f32 %v2115_v47, %v2114_v31  ;;  %v2163_v9 = vrot.slane %v2162_v12, 1 }
 0x256   :  { %v2117_v10 = vadd.f32 %v2116_v27, %v5010_v46  ;;  %v2164_v51 = vadd.f32 %v2163_v9, %v2162_v12 }
 0x258   :  { %v2165_v43 = vadd.f32 %v2164_v51, %v5013_v17  ;;  %v3518_v50 = vadd.f32 %v3517_v24, %v2117_v10 }
 0x25a   :  { %v3563_v20 = vadd.f32 %v3562_v3, %v2165_v43 }
 0x25c   :  { %v3566_v13 = vsel %vm3565_vm8, %v3518_v50, %v3563_v20 }
 0x25d   :  { %v3567_v15 = vadd.f32 %v3566_v13, %v3564_v63 }
 0x25f   :  { %3568 = vst.msk [vmem:[#allocation7] sm:$0x3] %vm52_vm7, %v3567_v15 }
 0x260   :  { %4005 = shalt.err (!%p4002_p0)
}
 0x261   :  { %3578 = dma.vmem_to_hbm [thread:$0]  %s3576_s26, 32, %s5068_s2, [#allocation4]  }
 0x262   :  { %4018 = dma.done.wait [#allocation4], 32  }
 0x263   :  { %4019 = vsyncadd [#allocation4], 4294967264 }
 0x264   :  { %3582 = vsyncpa [#allocation3], 1 }
 0x265   :  { %3583 = vsyncpa [#allocation6], 1 }
 0x266   :  { %3584 = vsyncpa [#allocation4], 1 }

</bundles_post_ra>
